<compile_context>
chip_gen: v6e
topology: v6e:2x2x1
jax: 0.10.0
libtpu: 0.0.40
codegen_flags: <defaults>
</compile_context>

<pallas_src>
from functools import partial

import jax
import jax.numpy as jnp
from jax.experimental import pallas as pl
from jax.experimental.pallas import tpu as pltpu

# Module hyperparameters implied by MLP() defaults + wrapper (+1 for time dim):
INPUT_DIM = 2                      # MLP.input_dim
TIME_DIM = 1                       # MLP.time_dim
F_IN = INPUT_DIM + TIME_DIM        # wrapper input_dim = 3
HIDDEN = 32                        # small hidden_dim for the demo (MLP default 128)
F_OUT = INPUT_DIM                  # MLP output_dim defaults to input_dim = 2


def _mlp_sum_kernel(xt_ref,
                    w1_ref, b1_ref,
                    w2_ref, b2_ref,
                    w3_ref, b3_ref,
                    w4s_ref, b4s_ref,
                    o_ref):
    """4-layer MLP + sum over output features, on one (F_IN, TM) column tile.

    Activations are (features, rows): rows live on the lane axis, so the two
    hidden matmuls are full-lane-width MXU passes and the output row is a
    lane-dense (1, TM) store.  w2/w3 arrive as bf16; w4s/b4s are the
    pre-folded Linear(H,2)+sum(dim=1) vector/scalar computed in the wrapper.
    """
    xt = xt_ref[...]                                   # (F_IN, TM)   f32
    w1 = w1_ref[...]                                   # (HIDDEN, F_IN) f32

    # --- layer 1: K = F_IN = 3 -> VPU outer-product (skip a nearly-empty MXU
    #     pass).  Single fused expression: one lane-splat of each w1 column and
    #     one sublane-splat of each x row, nothing recomputed per iteration.
    h = (b1_ref[...]
         + w1[:, 0:1] * xt[0:1, :]
         + w1[:, 1:2] * xt[1:2, :]
         + w1[:, 2:3] * xt[2:3, :])                    # (HIDDEN, TM)
    h = jnp.maximum(h, 0.0)

    # --- layers 2 & 3: native-bf16 MXU passes with fp32 accumulation.
    h = jnp.dot(w2_ref[...], h.astype(jnp.bfloat16),
                preferred_element_type=jnp.float32) + b2_ref[...]
    h = jnp.maximum(h, 0.0)
    h = jnp.dot(w3_ref[...], h.astype(jnp.bfloat16),
                preferred_element_type=jnp.float32) + b3_ref[...]
    h = jnp.maximum(h, 0.0)

    # --- layer 4 fused with .sum(dim=1):
    #     sum_o (W4 h + b4)[o] == w4s . h + b4s   (w4s/b4s precomputed outside)
    o_ref[...] = jnp.sum(h * w4s_ref[...], axis=0, keepdims=True) + b4s_ref[...]


def _pick_tm(n, tm_max):
    """Row tile: multiple of 128, as large as tm_max, but small enough that the
    grid has >= 2 steps whenever n > 128 (keeps both v7x TensorCores busy)."""
    tm_max = max(128, (tm_max // 128) * 128)
    half_rows = (n + 1) // 2
    two_step_tile = ((half_rows + 127) // 128) * 128
    return max(128, min(tm_max, two_step_tile))


@partial(jax.jit, static_argnames=("tm",))
def _forward(x, params, *, tm):
    """Pad+transpose, weight prep, pallas_call and output slice in one XLA program."""
    n = x.shape[0]
    n_pad = pl.cdiv(n, tm) * tm

    # Pad rows first, then transpose (fuses into one copy); result is lane-dense.
    xt = jnp.pad(x, ((0, n_pad - n), (0, 0))).T        # (F_IN, n_pad)

    # Weight prep (loop-invariant, hoisted out of the kernel body).
    w1 = params["w1"]                                  # (HIDDEN, F_IN)  f32
    w2 = params["w2"].astype(jnp.bfloat16)             # (HIDDEN, HIDDEN) bf16 MXU
    w3 = params["w3"].astype(jnp.bfloat16)             # (HIDDEN, HIDDEN) bf16 MXU
    b1 = params["b1"].reshape(HIDDEN, 1)
    b2 = params["b2"].reshape(HIDDEN, 1)
    b3 = params["b3"].reshape(HIDDEN, 1)
    w4s = jnp.sum(params["w4"], axis=0).reshape(HIDDEN, 1)   # fold of Linear(H,2)+sum
    b4s = jnp.sum(params["b4"]).reshape(1, 1)

    # Weights/biases: fully resident blocks with constant index maps (no re-DMA).
    const = lambda a: pl.BlockSpec(a.shape, lambda i: (0, 0))

    flops = 2 * (F_IN + 2 * HIDDEN + 1) * HIDDEN * n_pad
    bytes_accessed = (F_IN + 1) * 4 * n_pad + 5 * HIDDEN * HIDDEN

    out = pl.pallas_call(
        _mlp_sum_kernel,
        out_shape=jax.ShapeDtypeStruct((1, n_pad), jnp.float32),
        grid_spec=pl.GridSpec(
            grid=(n_pad // tm,),
            in_specs=[
                pl.BlockSpec((F_IN, tm), lambda i: (0, i)),     # column tile of x^T
                const(w1), const(b1),
                const(w2), const(b2),
                const(w3), const(b3),
                const(w4s), const(b4s),
            ],
            out_specs=pl.BlockSpec((1, tm), lambda i: (0, i)),  # lane-dense output row
        ),
        compiler_params=pltpu.CompilerParams(
            dimension_semantics=("parallel",)),                 # shards across TCs (v7x)
        cost_estimate=pl.CostEstimate(
            flops=flops, transcendentals=0, bytes_accessed=bytes_accessed),
    )(xt, w1, b1, w2, b2, w3, b3, w4s, b4s)

    # Padded tail columns hold ReLU(b1)-propagated junk -> sliced away here.
    return out[0, :n]                                  # (N,), matches out.sum(dim=1)


def mlp_wrapper_with_sum(x, params, *, tm_max=2048):
    """x: (N, F_IN) float32.  params: torch-layout W_i (out,in), b_i (out,)."""
    n, fin = x.shape
    assert fin == F_IN
    tm = _pick_tm(n, tm_max)
    return _forward(x, params, tm=tm)


def init_params(key):
    """Deterministic PyTorch-Linear-style init (uniform in +-1/sqrt(fan_in)).

    Weights are stored in torch's native (out_features, in_features) layout;
    biases as (out_features,).
    """
    dims = [(F_IN, HIDDEN), (HIDDEN, HIDDEN), (HIDDEN, HIDDEN), (HIDDEN, F_OUT)]
    params = {}
    for idx, (fan_in, fan_out) in enumerate(dims, start=1):
        key, kw, kb = jax.random.split(key, 3)
        bound = 1.0 / jnp.sqrt(fan_in)
        params[f"w{idx}"] = jax.random.uniform(
            kw, (fan_out, fan_in), jnp.float32, -bound, bound)
        params[f"b{idx}"] = jax.random.uniform(
            kb, (fan_out,), jnp.float32, -bound, bound)
    return params


def reference(x, params):
    """Pure-JAX f32 reference of the PyTorch forward pass (highest precision)."""
    h = x
    for idx in range(1, 4):
        h = jnp.maximum(
            jnp.dot(h, params[f"w{idx}"].T, precision=jax.lax.Precision.HIGHEST)
            + params[f"b{idx}"], 0.0)
    out = jnp.dot(h, params["w4"].T,
                  precision=jax.lax.Precision.HIGHEST) + params["b4"]
    return jnp.sum(out, axis=-1)


if __name__ == "__main__":
    key = jax.random.PRNGKey(0)
    key, kx = jax.random.split(key)

    N = 2000                    # not a multiple of the tile: exercises padding
    x = jax.random.normal(kx, (N, F_IN), jnp.float32)
    params = init_params(key)

    y = mlp_wrapper_with_sum(x, params)   # tm=1024 -> even 2-step parallel grid
    y = jax.block_until_ready(y)

    y_ref = reference(x, params)
    assert y.shape == (N,)
    err = jnp.max(jnp.abs(y - y_ref))
    # bf16 MXU operands for the two hidden layers -> loosened tolerance (review).
    assert jnp.allclose(y, y_ref, rtol=2e-2, atol=2e-2), f"max abs err {err}"

    print("KERNEL_OK")
</pallas_src>

<mosaic_0001>
module attributes {stable_mosaic.version = 11 : i64} {
  func.func @_mlp_sum_kernel(%arg0: i32, %arg1: memref<3x1024xf32, #tpu.memory_space<vmem>>, %arg2: memref<32x3xf32, #tpu.memory_space<vmem>>, %arg3: memref<32x1xf32, #tpu.memory_space<vmem>>, %arg4: memref<32x32xbf16, #tpu.memory_space<vmem>>, %arg5: memref<32x1xf32, #tpu.memory_space<vmem>>, %arg6: memref<32x32xbf16, #tpu.memory_space<vmem>>, %arg7: memref<32x1xf32, #tpu.memory_space<vmem>>, %arg8: memref<32x1xf32, #tpu.memory_space<vmem>>, %arg9: memref<1x1xf32, #tpu.memory_space<vmem>>, %arg10: memref<1x1024xf32, #tpu.memory_space<vmem>>) attributes {dimension_semantics = [#tpu.dimension_semantics<parallel>], iteration_bounds = array<i64: 2>, scalar_prefetch = 0 : i64, scratch_operands = 0 : i64, tpu.core_type = #tpu.core_type<tc>, window_params = [{transform_indices = @transform_0, window_bounds = array<i64: 3, 1024>}, {pipeline_mode = #tpu.pipeline_mode<synchronous>, transform_indices = @transform_1, window_bounds = array<i64: 32, 3>}, {pipeline_mode = #tpu.pipeline_mode<synchronous>, transform_indices = @transform_2, window_bounds = array<i64: 32, 1>}, {pipeline_mode = #tpu.pipeline_mode<synchronous>, transform_indices = @transform_3, window_bounds = array<i64: 32, 32>}, {pipeline_mode = #tpu.pipeline_mode<synchronous>, transform_indices = @transform_4, window_bounds = array<i64: 32, 1>}, {pipeline_mode = #tpu.pipeline_mode<synchronous>, transform_indices = @transform_5, window_bounds = array<i64: 32, 32>}, {pipeline_mode = #tpu.pipeline_mode<synchronous>, transform_indices = @transform_6, window_bounds = array<i64: 32, 1>}, {pipeline_mode = #tpu.pipeline_mode<synchronous>, transform_indices = @transform_7, window_bounds = array<i64: 32, 1>}, {pipeline_mode = #tpu.pipeline_mode<synchronous>, transform_indices = @transform_8, window_bounds = array<i64: 1, 1>}, {transform_indices = @transform_9, window_bounds = array<i64: 1, 1024>}]} {
    %c0 = arith.constant 0 : index
    %c0_0 = arith.constant 0 : index
    %0 = vector.load %arg1[%c0, %c0_0] : memref<3x1024xf32, #tpu.memory_space<vmem>>, vector<3x1024xf32>
    %c0_1 = arith.constant 0 : index
    %c0_2 = arith.constant 0 : index
    %1 = vector.load %arg2[%c0_1, %c0_2] : memref<32x3xf32, #tpu.memory_space<vmem>>, vector<32x3xf32>
    %c0_3 = arith.constant 0 : index
    %c0_4 = arith.constant 0 : index
    %2 = vector.load %arg3[%c0_3, %c0_4] : memref<32x1xf32, #tpu.memory_space<vmem>>, vector<32x1xf32>
    %3 = vector.extract_strided_slice %1 {offsets = [0, 0], sizes = [32, 1], strides = [1, 1]} : vector<32x3xf32> to vector<32x1xf32>
    %4 = vector.extract_strided_slice %0 {offsets = [0, 0], sizes = [1, 1024], strides = [1, 1]} : vector<3x1024xf32> to vector<1x1024xf32>
    %5 = vector.broadcast %3 : vector<32x1xf32> to vector<32x1024xf32>
    %6 = vector.broadcast %4 : vector<1x1024xf32> to vector<32x1024xf32>
    %7 = arith.mulf %5, %6 : vector<32x1024xf32>
    %8 = vector.broadcast %2 : vector<32x1xf32> to vector<32x1024xf32>
    %9 = arith.addf %8, %7 : vector<32x1024xf32>
    %10 = vector.extract_strided_slice %1 {offsets = [0, 1], sizes = [32, 1], strides = [1, 1]} : vector<32x3xf32> to vector<32x1xf32>
    %11 = vector.extract_strided_slice %0 {offsets = [1, 0], sizes = [1, 1024], strides = [1, 1]} : vector<3x1024xf32> to vector<1x1024xf32>
    %12 = vector.broadcast %10 : vector<32x1xf32> to vector<32x1024xf32>
    %13 = vector.broadcast %11 : vector<1x1024xf32> to vector<32x1024xf32>
    %14 = arith.mulf %12, %13 : vector<32x1024xf32>
    %15 = arith.addf %9, %14 : vector<32x1024xf32>
    %16 = vector.extract_strided_slice %1 {offsets = [0, 2], sizes = [32, 1], strides = [1, 1]} : vector<32x3xf32> to vector<32x1xf32>
    %17 = vector.extract_strided_slice %0 {offsets = [2, 0], sizes = [1, 1024], strides = [1, 1]} : vector<3x1024xf32> to vector<1x1024xf32>
    %18 = vector.broadcast %16 : vector<32x1xf32> to vector<32x1024xf32>
    %19 = vector.broadcast %17 : vector<1x1024xf32> to vector<32x1024xf32>
    %20 = arith.mulf %18, %19 : vector<32x1024xf32>
    %21 = arith.addf %15, %20 : vector<32x1024xf32>
    %cst = arith.constant 0.000000e+00 : f32
    %22 = vector.broadcast %cst : f32 to vector<32x1024xf32>
    %23 = arith.maximumf %21, %22 : vector<32x1024xf32>
    %c0_5 = arith.constant 0 : index
    %c0_6 = arith.constant 0 : index
    %24 = vector.load %arg4[%c0_5, %c0_6] : memref<32x32xbf16, #tpu.memory_space<vmem>>, vector<32x32xbf16>
    %25 = arith.truncf %23 : vector<32x1024xf32> to vector<32x1024xbf16>
    %cst_7 = arith.constant dense<0.000000e+00> : vector<32x1024xf32>
    %26 = tpu.matmul %24, %25, %cst_7 {dimension_numbers = #tpu.dot_dimension_numbers<[1], [0], [0], [1], [0, 0, 1, 1], [], []>} : vector<32x32xbf16>, vector<32x1024xbf16>, vector<32x1024xf32> -> vector<32x1024xf32>
    %c0_8 = arith.constant 0 : index
    %c0_9 = arith.constant 0 : index
    %27 = vector.load %arg5[%c0_8, %c0_9] : memref<32x1xf32, #tpu.memory_space<vmem>>, vector<32x1xf32>
    %28 = vector.broadcast %27 : vector<32x1xf32> to vector<32x1024xf32>
    %29 = arith.addf %26, %28 : vector<32x1024xf32>
    %cst_10 = arith.constant 0.000000e+00 : f32
    %30 = vector.broadcast %cst_10 : f32 to vector<32x1024xf32>
    %31 = arith.maximumf %29, %30 : vector<32x1024xf32>
    %c0_11 = arith.constant 0 : index
    %c0_12 = arith.constant 0 : index
    %32 = vector.load %arg6[%c0_11, %c0_12] : memref<32x32xbf16, #tpu.memory_space<vmem>>, vector<32x32xbf16>
    %33 = arith.truncf %31 : vector<32x1024xf32> to vector<32x1024xbf16>
    %cst_13 = arith.constant dense<0.000000e+00> : vector<32x1024xf32>
    %34 = tpu.matmul %32, %33, %cst_13 {dimension_numbers = #tpu.dot_dimension_numbers<[1], [0], [0], [1], [0, 0, 1, 1], [], []>} : vector<32x32xbf16>, vector<32x1024xbf16>, vector<32x1024xf32> -> vector<32x1024xf32>
    %c0_14 = arith.constant 0 : index
    %c0_15 = arith.constant 0 : index
    %35 = vector.load %arg7[%c0_14, %c0_15] : memref<32x1xf32, #tpu.memory_space<vmem>>, vector<32x1xf32>
    %36 = vector.broadcast %35 : vector<32x1xf32> to vector<32x1024xf32>
    %37 = arith.addf %34, %36 : vector<32x1024xf32>
    %cst_16 = arith.constant 0.000000e+00 : f32
    %38 = vector.broadcast %cst_16 : f32 to vector<32x1024xf32>
    %39 = arith.maximumf %37, %38 : vector<32x1024xf32>
    %c0_17 = arith.constant 0 : index
    %c0_18 = arith.constant 0 : index
    %40 = vector.load %arg8[%c0_17, %c0_18] : memref<32x1xf32, #tpu.memory_space<vmem>>, vector<32x1xf32>
    %41 = vector.broadcast %40 : vector<32x1xf32> to vector<32x1024xf32>
    %42 = arith.mulf %39, %41 : vector<32x1024xf32>
    %cst_19 = arith.constant dense<0.000000e+00> : vector<1024xf32>
    %43 = vector.multi_reduction <add>, %42, %cst_19 [0] : vector<32x1024xf32> to vector<1024xf32>
    %44 = vector.shape_cast %43 : vector<1024xf32> to vector<1x1024xf32>
    %c0_20 = arith.constant 0 : index
    %c0_21 = arith.constant 0 : index
    %45 = vector.load %arg9[%c0_20, %c0_21] : memref<1x1xf32, #tpu.memory_space<vmem>>, vector<1x1xf32>
    %46 = vector.broadcast %45 : vector<1x1xf32> to vector<1x1024xf32>
    %47 = arith.addf %44, %46 : vector<1x1024xf32>
    %c0_22 = arith.constant 0 : index
    %c0_23 = arith.constant 0 : index
    %48 = vector.load %arg10[%c0_22, %c0_23] : memref<1x1024xf32, #tpu.memory_space<vmem>>, vector<1x1024xf32>
    tpu.vector_store %arg10[%c0_22, %c0_23], %47 {strides = array<i32>} : memref<1x1024xf32, #tpu.memory_space<vmem>>, vector<1x1024xf32>,
    return
  }
  func.func @transform_0(%arg0: i32) -> (i32, i32) {
    %c0_i32 = arith.constant 0 : i32
    %c0_i32_0 = arith.constant 0 : i32
    return %c0_i32, %arg0 : i32, i32
  }
  func.func @transform_1(%arg0: i32) -> (i32, i32) {
    %c0_i32 = arith.constant 0 : i32
    %c0_i32_0 = arith.constant 0 : i32
    %c0_i32_1 = arith.constant 0 : i32
    return %c0_i32, %c0_i32_0 : i32, i32
  }
  func.func @transform_2(%arg0: i32) -> (i32, i32) {
    %c0_i32 = arith.constant 0 : i32
    %c0_i32_0 = arith.constant 0 : i32
    %c0_i32_1 = arith.constant 0 : i32
    return %c0_i32, %c0_i32_0 : i32, i32
  }
  func.func @transform_3(%arg0: i32) -> (i32, i32) {
    %c0_i32 = arith.constant 0 : i32
    %c0_i32_0 = arith.constant 0 : i32
    %c0_i32_1 = arith.constant 0 : i32
    return %c0_i32, %c0_i32_0 : i32, i32
  }
  func.func @transform_4(%arg0: i32) -> (i32, i32) {
    %c0_i32 = arith.constant 0 : i32
    %c0_i32_0 = arith.constant 0 : i32
    %c0_i32_1 = arith.constant 0 : i32
    return %c0_i32, %c0_i32_0 : i32, i32
  }
  func.func @transform_5(%arg0: i32) -> (i32, i32) {
    %c0_i32 = arith.constant 0 : i32
    %c0_i32_0 = arith.constant 0 : i32
    %c0_i32_1 = arith.constant 0 : i32
    return %c0_i32, %c0_i32_0 : i32, i32
  }
  func.func @transform_6(%arg0: i32) -> (i32, i32) {
    %c0_i32 = arith.constant 0 : i32
    %c0_i32_0 = arith.constant 0 : i32
    %c0_i32_1 = arith.constant 0 : i32
    return %c0_i32, %c0_i32_0 : i32, i32
  }
  func.func @transform_7(%arg0: i32) -> (i32, i32) {
    %c0_i32 = arith.constant 0 : i32
    %c0_i32_0 = arith.constant 0 : i32
    %c0_i32_1 = arith.constant 0 : i32
    return %c0_i32, %c0_i32_0 : i32, i32
  }
  func.func @transform_8(%arg0: i32) -> (i32, i32) {
    %c0_i32 = arith.constant 0 : i32
    %c0_i32_0 = arith.constant 0 : i32
    %c0_i32_1 = arith.constant 0 : i32
    return %c0_i32, %c0_i32_0 : i32, i32
  }
  func.func @transform_9(%arg0: i32) -> (i32, i32) {
    %c0_i32 = arith.constant 0 : i32
    %c0_i32_0 = arith.constant 0 : i32
    return %c0_i32, %arg0 : i32, i32
  }
}

</mosaic_0001>

<bundles_post_ra>
// kernel: _forward.1
= control target key start
LH: loop header
LB: loop body
LE: loop exit
PB: predicated region body
PF: predicated region fallthrough
CT: control target
= control target key end

     0   :  { %s2628_s0 = inlined_call_operand.vmem [shape: f32[3,2048], index: 0, kind: input, shape index: {}]   ;;  %s2629_s1 = inlined_call_operand.vmem [shape: f32[32,3], index: 1, kind: input, shape index: {}]   ;;  %s2630_s2 = inlined_call_operand.vmem [shape: f32[32,1], index: 2, kind: input, shape index: {}]   ;;  %s2631_s3 = inlined_call_operand.vmem [shape: bf16[32,32], index: 3, kind: input, shape index: {}]   ;;  %s2632_s4 = inlined_call_operand.vmem [shape: f32[32,1], index: 4, kind: input, shape index: {}]   ;;  %s2633_s5 = inlined_call_operand.vmem [shape: bf16[32,32], index: 5, kind: input, shape index: {}]   ;;  %s2634_s6 = inlined_call_operand.vmem [shape: f32[32,1], index: 6, kind: input, shape index: {}]   ;;  %s2635_s7 = inlined_call_operand.vmem [shape: f32[32,1], index: 7, kind: input, shape index: {}]   ;;  %s2636_s8 = inlined_call_operand.<no memory space> [shape: f32[1,1], index: 8, kind: input, shape index: {}]   ;;  %s2637_s9 = inlined_call_operand.hbm [shape: f32[1,2048], index: 9, kind: output, shape index: {}]  }
   0x1   :  { %v14_v0 = vstv %s2636_s8 }
   0x2   :  { %15 = vst [vmem:[#allocation2] sm:$0x1] %v14_v0 }
   0x3   :  { %16 = vsyncpa [#allocation4], 0 }
   0x4   :  { %18 = vsyncpa [#allocation4 + $0x1], 0  ;;  %s1965_s11 = smov 0   ;;  %s1967_s12 = smov 0  }
   0x5   :  { %s1969_s13 = smov 0   ;;  %s1971_s14 = smov 0  }
   0x6 LB: > { %s1986_s8 = sadd.s32 4294967295, %s1905_s14   ;;  %s1753_s15 = sadd.s32 4294967294, %s1905_s14   ;;  %s1905_s14 = sphi %s1971_s14, %s2692_s14   ;;  %s1901_s13 = sphi %s1969_s13, %s2691_s13   ;;  %s1897_s12 = sphi %s1967_s12, %s2690_s12   ;;  %s1893_s11 = sphi %s1965_s11, %s2689_s11  }
   0x7   : > { %s1990_s16 = sadd.s32 1, %s1905_s14   ;;  %s225_s17 = sadd.s32 1, %s1901_s13 }
   0x8   : > { %s222_s18 = ssub.s32 %s1905_s14, %s1990_s16  ;;  %p235_p0 = scmp.ne.s32.totalorder %s1901_s13, %s1897_s12 }
   0x9   : > { %p223_p1 = scmp.eq.s32.totalorder %s222_s18, 0  ;;  %p236_p2 = scmp.eq.s32.totalorder %s1986_s8, 1 }
   0xa   : > { %p241_p3 = scmp.ne.s32.totalorder %s1897_s12, %s1893_s11  ;;  %p242_p4 = scmp.eq.s32.totalorder %s1753_s15, 1 }
   0xb   : > { %s2001_s19 = scalar_select %p223_p1, %s1901_s13, %s225_s17  }
   0xc   : > { %p2003_p5 = por %p236_p2, %p235_p0  ;;  %p2007_p6 = por %p242_p4, %p241_p3 }
   0xd   : > { %p1756_p7 = scmp.ge.s32.totalorder %s1905_s14, 1  ;;  %p293_p8 = scmp.lt.s32.totalorder %s1905_s14, 3 }
   0xf   : > { %p294_p9 = pnand %p1756_p7, %p293_p8 }
  0x11   : > { %297 = sbr.rel (%p294_p9) target bundleno = 691 (0x2b3), region = 56 }
  0x16   : > { %v347_v1 = vld [vmem:[%s2630_s2 + $0x10] sm:$0xff]  ;;  %v2638_v3 = vmov 0   ;;  %v348_v4 = vld [vmem:[%s2630_s2 + $0x18] sm:$0xff]  ;;  %v342_v6 = vld [vmem:[%s2629_s1 + $0x8] sm:$0xff]  ;;  %v1908_v7 = vmov 1   ;;  %v1909_v10 = vmov 2   ;;  %v373_v24 = vlaneseq }
  0x17   : > { %v343_v2 = vld [vmem:[%s2629_s1 + $0x10] sm:$0xff]  ;;  %1830 = vset.pattern.permute.xlu1 %v2638_v3  ;;  %1829 = vset.pattern.permute.xlu0 %v2638_v3  ;;  %v344_v5 = vld [vmem:[%s2629_s1 + $0x18] sm:$0xff]  ;;  %v345_v8 = vld [vmem:[%s2630_s2] sm:$0xff]  ;;  %s1758_s15 = sshll.u32 %s1986_s8, 3  ;;  %vm919_vm0 = vcmask 261120   ;;  %s326_s23 = sand.u32 1, %s1897_s12  }
  0x18   : > { %489 = vperm.xlu1 %1830, %v347_v1   ;;  %361 = vperm.xlu0 %1829, %v343_v2   ;;  %v341_v9 = vld [vmem:[%s2629_s1] sm:$0xff]  ;;  %v346_v11 = vld [vmem:[%s2630_s2 + $0x8] sm:$0xff]  ;;  %v887_v12 = vld [vmem:[%s2632_s4 + $0x10] sm:$0xff]  ;;  %p330_p10 = scmp.lt.s32.totalorder %s1758_s15, 15  ;;  %v2082_v26 = vshrl.u32 %v373_v24, 7  ;;  %s1785_s25 = sshll.u32 %s1986_s8, 7 }
  0x19   : > { %958 = vmatprep.mubr.bf16.mxu0 %v2638_v3  ;;  %1011 = vmatprep.mubr.bf16.mxu1 %v2638_v3  ;;  %v885_v13 = vld [vmem:[%s2632_s4] sm:$0xff]  ;;  %v888_v14 = vld [vmem:[%s2632_s4 + $0x18] sm:$0xff]  ;;  %v1191_v15 = vld [vmem:[%s2634_s6 + $0x8] sm:$0xff]  ;;  %s1692_s30 = scalar_lea.hbm %s2637_s9, %s1785_s25  ;;  %s1680_s10 = scalar_lea.sflag [#allocation4], %s326_s23 }
  0x1a   : > { %v886_v16 = vld [vmem:[%s2632_s4 + $0x8] sm:$0xff]  ;;  %v1193_v17 = vld [vmem:[%s2634_s6 + $0x18] sm:$0xff]  ;;  %v1190_v18 = vld [vmem:[%s2634_s6] sm:$0xff]  ;;  %s2694_s15 = smov (!%p330_p10, %s1758_s15), 15  ;;  %2656 = vst [vmem:[#allocation6_spill] sm:$0xff] %v2082_v26  ;;  %v379_v27 = vsub.s32 4, %v2082_v26 }
  0x1b   : > { %v1475_v19 = vld [vmem:[%s2635_s7 + $0x8] sm:$0xff]  ;;  %v1192_v20 = vld [vmem:[%s2634_s6 + $0x10] sm:$0xff]  ;;  %v1477_v21 = vld [vmem:[%s2635_s7 + $0x18] sm:$0xff]  ;;  %s1759_s24 = sshll.u32 %s2694_s15, 2  ;;  %v551_v28 = vsub.s32 5, %v2082_v26  ;;  %v2090_v30 = vsub.s32 0, %v2082_v26 }
  0x1c   : > { %494 = vperm.xlu1 %1830, %v348_v4   ;;  %366 = vperm.xlu0 %1829, %v344_v5   ;;  %v1474_v22 = vld [vmem:[%s2635_s7] sm:$0xff]  ;;  %v1476_v23 = vld [vmem:[%s2635_s7 + $0x10] sm:$0xff]  ;;  %s333_s27 = scalar_lea.vmem %s2628_s0, %s1759_s24  ;;  %v547_v31 = vsub.s32 1, %v2082_v26  ;;  %v703_v35 = vsub.s32 6, %v2082_v26  ;;  %v699_v40 = vsub.s32 2, %v2082_v26  ;;  %s1757_s24 = sshll.u32 %s326_s23, 3 }
  0x1d   : > { %v1602_v25 = vld [vmem:[#allocation2] sm:$0x1]  ;;  %2657 = vst [vmem:[#allocation7_spill] sm:$0xff] %v2090_v30  ;;  %v338_v32 = vld [vmem:[%s333_s27 + $0x8] sm:$0x77]  ;;  %s328_s26 = scalar_lea.vmem [#allocation3], %s1757_s24 }
  0x1e   : > { %v337_v29 = vld [vmem:[%s333_s27] sm:$0x77]  ;;  %v388_v36 = vrot.slane %v338_v32, %v379_v27  ;;  %v560_v37 = vrot.slane %v338_v32, %v551_v28  ;;  %v384_v41 = vrot.slane %v338_v32, %v2090_v30  ;;  %v339_v45 = vld [vmem:[%s333_s27 + $0x10] sm:$0x77]  ;;  %v340_v46 = vld [vmem:[%s333_s27 + $0x18] sm:$0x77]  ;;  %v712_v51 = vrot.slane %v338_v32, %v703_v35 }
  0x1f   : > { %v380_v33 = vrot.slane %v337_v29, %v379_v27  ;;  %v552_v34 = vrot.slane %v337_v29, %v551_v28  ;;  %v376_v38 = vrot.slane %v337_v29, %v2090_v30  ;;  %v548_v39 = vrot.slane %v337_v29, %v547_v31  ;;  %s1694_s27 = sshll.u32 %s328_s26, 4  ;;  %s1911_s17 = smov [#allocation3]   ;;  %s1695_s27 = int_to_ptr.vmem [resolvable:$true] %s1694_s27 }
  0x20   : > { %1831 = vset.pattern.permute.xlu1 %v1908_v7  ;;  %356 = vperm.xlu0 %1829, %v342_v6   ;;  %v704_v44 = vrot.slane %v337_v29, %v703_v35  ;;  %v2103_v47 = vrot.slane %v388_v36, %v2090_v30  ;;  %v2105_v48 = vrot.slane %v560_v37, %v547_v31  ;;  %s1845_s15 = scalar_lea.vmem %s1695_s27, 128  ;;  %s1849_s18 = sshll.u32 %s1911_s17, 4  ;;  %s1850_s18 = int_to_ptr.vmem [resolvable:$false] %s1849_s18 }
  0x21   : > { %542 = vperm.xlu1 %1831, %v344_v5   ;;  %v2098_v42 = vrot.slane %v380_v33, %v2090_v30  ;;  %v2100_v43 = vrot.slane %v552_v34, %v547_v31  ;;  %v2108_v49 = vrot.slane %v376_v38, %v2090_v30  ;;  %v2110_v50 = vrot.slane %v548_v39, %v547_v31  ;;  %p1846_p11 = scmp.ne.s32.totalorder %s1695_s27, %s1845_s15  ;;  %s1851_s8 = scalar_lea.vmem %s1850_s18, 256 }
  0x22   : > { %v700_v52 = vrot.slane %v337_v29, %v699_v40  ;;  %v556_v53 = vrot.slane %v338_v32, %v547_v31  ;;  %v708_v54 = vrot.slane %v338_v32, %v699_v40  ;;  %v2113_v55 = vrot.slane %v384_v41, %v2090_v30  ;;  %p1852_p0 = scmp.lt.s32.totalorder %s1695_s27, %s1850_s18  ;;  %p1853_p1 = scmp.lt.s32.totalorder %s1851_s8, %s1845_s15 }
  0x23   : > { %v396_v56 = vrot.slane %v339_v45, %v379_v27  ;;  %v568_v57 = vrot.slane %v339_v45, %v551_v28  ;;  %v404_v58 = vrot.slane %v340_v46, %v379_v27  ;;  %v2115_v59 = vrot.slane %v704_v44, %v699_v40  ;;  %p1847_p12 = pnand %p1846_p11, %p2003_p5 }
  0x24   : > { %479 = vperm.xlu0 %1829, %v345_v8   ;;  %v576_v60 = vrot.slane %v340_v46, %v551_v28  ;;  %v392_v61 = vrot.slane %v339_v45, %v2090_v30  ;;  %v400_v62 = vrot.slane %v340_v46, %v2090_v30  ;;  %v720_v63 = vrot.slane %v339_v45, %v703_v35  ;;  %p1854_p2 = por %p1853_p1, %p1852_p0 }
  0x25   : > { %1832 = vset.pattern.permute.xlu1 %v2638_v3  ;;  %v728_v0 = vrot.slane %v340_v46, %v703_v35  ;;  %v564_v1 = vrot.slane %v339_v45, %v547_v31  ;;  %v2119_v4 = vrot.slane %v712_v51, %v699_v40  ;;  %v2128_v8 = vrot.slane %v396_v56, %v2090_v30  ;;  %p1848_p13 = pneg %p1847_p12 }
  0x26   : > { %351 = vperm.xlu1 %1832, %v341_v9  }
  0x27   : > { %p1855_p3 = pnand %p1854_p2, %p1848_p13 }
  0x28   : > { %1834 = vset.pattern.permute.xlu0 %v1908_v7 }
  0x29   : > { %538 = vperm.xlu0 %1834, %v343_v2  }
  0x2a   : > { %1833 = vset.pattern.permute.xlu1 %v1909_v10 }
  0x2b   : > { %690 = vperm.xlu1 %1833, %v343_v2   ;;  %v572_v2 = vrot.slane %v340_v46, %v547_v31 }
  0x2d   : > { %530 = vperm.xlu0 %1834, %v341_v9  }
  0x2f   : > { %694 = vperm.xlu1 %1833, %v344_v5   ;;  %v2121_v5 = vrot.slane %v700_v52, %v699_v40 }
  0x31   : > { %1838 = vset.pattern.permute.xlu0 %v1909_v10 }
  0x32   : > { %686 = vperm.xlu0 %1838, %v342_v6  }
  0x33   : > { %1835 = vset.pattern.permute.xlu1 %v2638_v3 }
  0x34   : > { %484 = vperm.xlu1 %1835, %v346_v11   ;;  %v724_v11 = vrot.slane %v340_v46, %v699_v40 }
  0x36   : > { %1840 = vset.pattern.permute.xlu0 %v2638_v3  ;;  %v2159_v32 = vrot.slane %v724_v11, %v699_v40 }
  0x37   : > { %891 = vperm.xlu0 %1840, %v885_v13   ;;  %v2135_v13 = vrot.slane %v576_v60, %v547_v31 }
  0x38   : > { %1836 = vset.pattern.permute.xlu1 %v1908_v7  ;;  %v2125_v7 = vrot.slane %v708_v54, %v699_v40 }
  0x39   : > { %534 = vperm.xlu1 %1836, %v342_v6   ;;  %v2123_v6 = vrot.slane %v556_v53, %v547_v31  ;;  %2659 = vst [vmem:[#allocation9_spill] sm:$0xff] %v2135_v13 }
  0x3b   : > { %1201 = vperm.xlu0 %1840, %v1191_v15   ;;  %v2141_v15 = vrot.slane %v400_v62, %v2090_v30 }
  0x3d   : > { %1837 = vset.pattern.permute.xlu1 %v1909_v10  ;;  %v716_v10 = vrot.slane %v339_v45, %v699_v40 }
  0x3e   : > { %682 = vperm.xlu1 %1837, %v341_v9   ;;  %v2131_v9 = vrot.slane %v404_v58, %v2090_v30 }
  0x3f   : > { %1211 = vperm.xlu0 %1840, %v1193_v17   ;;  %v2157_v29 = vrot.slane %v716_v10, %v699_v40 }
  0x42   : > { %1839 = vset.pattern.permute.xlu1 %v2638_v3 }
  0x43   : > { %901 = vperm.xlu1 %1839, %v887_v12   ;;  %1485 = vperm.xlu0 %1840, %v1475_v19   ;;  %v2133_v12 = vrot.slane %v568_v57, %v547_v31  ;;  %v2145_v19 = vrot.slane %v728_v0, %v699_v40 }
  0x45   : > { %2658 = vst [vmem:[#allocation8_spill] sm:$0xff] %v2133_v12 }
  0x47   : > { %906 = vperm.xlu1 %1839, %v888_v14   ;;  %1495 = vperm.xlu0 %1840, %v1477_v21   ;;  %v2138_v14 = vrot.slane %v392_v61, %v2090_v30  ;;  %v2149_v21 = vrot.slane %v572_v2, %v547_v31 }
  0x49   : > { %2661 = vst [vmem:[#allocation11_spill] sm:$0xff] %v2149_v21 }
  0x4b   : > { %896 = vperm.xlu1 %1839, %v886_v16  }
  0x4f   : > { %1196 = vperm.xlu1 %1839, %v1190_v18   ;;  %v2143_v18 = vrot.slane %v720_v63, %v699_v40 }
  0x53   : > { %1206 = vperm.xlu1 %1839, %v1192_v20   ;;  %v2147_v20 = vrot.slane %v564_v1, %v547_v31 }
  0x55   : > { %2660 = vst [vmem:[#allocation10_spill] sm:$0xff] %v2147_v20 }
  0x57   : > { %1480 = vperm.xlu1 %1839, %v1474_v22  }
  0x5b   : > { %1490 = vperm.xlu1 %1839, %v1476_v23  }
  0x5f   : > { %1605 = vperm.xlu1 %1839, %v1602_v25  }
  0x93   : > { %v490_v16 = vpop.permute.xlu1 %489  ;;  %v362_v17 = vpop.permute.xlu0 %361 }
  0x94   : > { %v462_v22 = vmul.f32 %v2098_v42, %v362_v17  ;;  %v464_v23 = vmul.f32 %v2103_v47, %v362_v17  ;;  %v461_v24 = vmul.f32 %v2108_v49, %v362_v17  ;;  %v463_v25 = vmul.f32 %v2113_v55, %v362_v17 }
  0x95   : > { %v466_v27 = vmul.f32 %v2128_v8, %v362_v17  ;;  %v468_v28 = vmul.f32 %v2131_v9, %v362_v17  ;;  %v465_v34 = vmul.f32 %v2138_v14, %v362_v17  ;;  %v467_v35 = vmul.f32 %v2141_v15, %v362_v17 }
  0x96   : > { %v2161_v33 = vadd.f32 %v490_v16, %v462_v22  ;;  %v2163_v31 = vadd.f32 %v490_v16, %v464_v23  ;;  %v2167_v38 = vadd.f32 %v490_v16, %v461_v24  ;;  %v2169_v39 = vadd.f32 %v490_v16, %v463_v25 }
  0x97   : > { %v495_v36 = vpop.permute.xlu1 %494  ;;  %v367_v37 = vpop.permute.xlu0 %366  ;;  %v2171_v41 = vadd.f32 %v490_v16, %v466_v27  ;;  %v2173_v44 = vadd.f32 %v490_v16, %v468_v28  ;;  %v2183_v60 = vadd.f32 %v490_v16, %v465_v34  ;;  %v2185_v61 = vadd.f32 %v490_v16, %v467_v35 }
  0x98   : > { %v470_v40 = vmul.f32 %v2098_v42, %v367_v37  ;;  %v472_v45 = vmul.f32 %v2103_v47, %v367_v37  ;;  %v469_v46 = vmul.f32 %v2108_v49, %v367_v37  ;;  %v471_v51 = vmul.f32 %v2113_v55, %v367_v37 }
  0x99   : > { %v474_v52 = vmul.f32 %v2128_v8, %v367_v37  ;;  %v476_v53 = vmul.f32 %v2131_v9, %v367_v37  ;;  %v473_v54 = vmul.f32 %v2138_v14, %v367_v37  ;;  %v475_v56 = vmul.f32 %v2141_v15, %v367_v37 }
  0x9a   : > { %v522_v57 = vadd.f32 %v495_v36, %v470_v40  ;;  %v524_v58 = vadd.f32 %v495_v36, %v472_v45  ;;  %v521_v63 = vadd.f32 %v495_v36, %v469_v46  ;;  %v523_v0 = vadd.f32 %v495_v36, %v471_v51 }
  0x9b   : > { %v357_v62 = vpop.permute.xlu0 %356  ;;  %v526_v1 = vadd.f32 %v495_v36, %v474_v52  ;;  %v528_v2 = vadd.f32 %v495_v36, %v476_v53  ;;  %v525_v22 = vadd.f32 %v495_v36, %v473_v54  ;;  %v527_v23 = vadd.f32 %v495_v36, %v475_v56 }
  0x9c   : > { %v543_v10 = vpop.permute.xlu1 %542  ;;  %v2188_v11 = vmul.f32 %v2098_v42, %v357_v62  ;;  %v2191_v17 = vmul.f32 %v2103_v47, %v357_v62  ;;  %v2204_v46 = vmul.f32 %v2108_v49, %v357_v62  ;;  %v2207_v51 = vmul.f32 %v2113_v55, %v357_v62 }
  0x9d   : > { %v642_v24 = vmul.f32 %v2100_v43, %v543_v10  ;;  %v644_v25 = vmul.f32 %v2105_v48, %v543_v10  ;;  %v641_v16 = vmul.f32 %v2110_v50, %v543_v10  ;;  %v643_v27 = vmul.f32 %v2123_v6, %v543_v10 }
  0x9e   : > { %v646_v28 = vmul.f32 %v2133_v12, %v543_v10  ;;  %v648_v34 = vmul.f32 %v2135_v13, %v543_v10  ;;  %v645_v35 = vmul.f32 %v2147_v20, %v543_v10  ;;  %v647_v37 = vmul.f32 %v2149_v21, %v543_v10 }
  0x9f   : > { %v2201_v40 = vpop.permute.xlu0 %479  ;;  %v674_v45 = vadd.f32 %v642_v24, %v522_v57  ;;  %v676_v36 = vadd.f32 %v644_v25, %v524_v58  ;;  %v673_v52 = vadd.f32 %v641_v16, %v521_v63  ;;  %v675_v53 = vadd.f32 %v643_v27, %v523_v0 }
  0xa0   : > { %2662 = vst [vmem:[#allocation12_spill] sm:$0xff] %v2201_v40  ;;  %v2209_v54 = vadd.f32 %v646_v28, %v526_v1  ;;  %v2211_v56 = vadd.f32 %v648_v34, %v528_v2  ;;  %v2213_v26 = vadd.f32 %v645_v35, %v525_v22  ;;  %v2215_v10 = vadd.f32 %v647_v37, %v527_v23 }
  0xa1   : > { %v352_v3 = vpop.permute.xlu1 %351  ;;  %v2218_v57 = vmul.f32 %v2128_v8, %v357_v62  ;;  %v2221_v58 = vmul.f32 %v2131_v9, %v357_v62  ;;  %v2234_v23 = vmul.f32 %v2138_v14, %v357_v62  ;;  %v2237_v25 = vmul.f32 %v2141_v15, %v357_v62 }
  0xa2   : > { %2663 = vst [vmem:[#allocation13_spill] sm:$0xff] %v2215_v10  ;;  %v446_v24 = vmul.f32 %v2098_v42, %v352_v3  ;;  %v448_v63 = vmul.f32 %v2103_v47, %v352_v3  ;;  %v445_v0 = vmul.f32 %v2108_v49, %v352_v3  ;;  %v447_v1 = vmul.f32 %v2113_v55, %v352_v3 }
  0xa3   : > { %2664 = vst [vmem:[#allocation14_spill] sm:$0xff] %v2218_v57  ;;  %2665 = vst [vmem:[#allocation15_spill] sm:$0xff] %v2221_v58  ;;  %v2228_v2 = vmul.f32 %v2128_v8, %v352_v3  ;;  %v2231_v22 = vmul.f32 %v2131_v9, %v352_v3  ;;  %v2242_v49 = vmul.f32 %v2138_v14, %v352_v3 }
  0xa4   : > { %2667 = vst [vmem:[#allocation17_spill] sm:$0xff] %v2234_v23  ;;  %2668 = vst [vmem:[#allocation18_spill] sm:$0xff] %v2237_v25  ;;  %v539_v16 = vpop.permute.xlu0 %538  ;;  %v498_v42 = vadd.f32 %v2201_v40, %v446_v24  ;;  %v500_v47 = vadd.f32 %v2201_v40, %v448_v63  ;;  %v2245_v55 = vmul.f32 %v2141_v15, %v352_v3 }
  0xa5   : > { %2666 = vst [vmem:[#allocation16_spill] sm:$0xff] %v2231_v22  ;;  %2669 = vst [vmem:[#allocation19_spill] sm:$0xff] %v2242_v49  ;;  %v634_v8 = vmul.f32 %v2100_v43, %v539_v16  ;;  %v636_v9 = vmul.f32 %v2105_v48, %v539_v16  ;;  %v633_v27 = vmul.f32 %v2110_v50, %v539_v16 }
  0xa6   : > { %2670 = vst [vmem:[#allocation20_spill] sm:$0xff] %v2245_v55  ;;  %v635_v62 = vmul.f32 %v2123_v6, %v539_v16  ;;  %v2251_v28 = vpop.permute.xlu1 %690  ;;  %v2254_v34 = vadd.f32 %v2201_v40, %v445_v0  ;;  %v2257_v35 = vadd.f32 %v2201_v40, %v447_v1  ;;  %v638_v14 = vmul.f32 %v2133_v12, %v539_v16 }
  0xa7   : > { %v640_v3 = vmul.f32 %v2135_v13, %v539_v16  ;;  %v666_v15 = vadd.f32 %v634_v8, %v2161_v33  ;;  %v786_v37 = vmul.f32 %v2115_v59, %v2251_v28  ;;  %v668_v24 = vadd.f32 %v636_v9, %v2163_v31 }
  0xa8   : > { %v788_v63 = vmul.f32 %v2119_v4, %v2251_v28  ;;  %v2267_v30 = vpop.permute.xlu0 %530  ;;  %v665_v0 = vadd.f32 %v633_v27, %v2167_v38  ;;  %v785_v1 = vmul.f32 %v2121_v5, %v2251_v28  ;;  %v667_v25 = vadd.f32 %v635_v62, %v2169_v39 }
  0xa9   : > { %2671 = vst [vmem:[#allocation21_spill] sm:$0xff] %v2267_v30  ;;  %v787_v33 = vmul.f32 %v2125_v7, %v2251_v28  ;;  %v818_v8 = vadd.f32 %v786_v37, %v666_v15  ;;  %v2276_v23 = vmul.f32 %v2147_v20, %v539_v16  ;;  %v2279_v31 = vmul.f32 %v2149_v21, %v539_v16 }
  0xaa   : > { %v820_v55 = vadd.f32 %v788_v63, %v668_v24  ;;  %v2281_v9 = vpop.permute.xlu1 %694  ;;  %v817_v49 = vadd.f32 %v785_v1, %v665_v0  ;;  %v618_v27 = vmul.f32 %v2100_v43, %v2267_v30  ;;  %v620_v39 = vmul.f32 %v2105_v48, %v2267_v30 }
  0xab   : > { %v819_v38 = vadd.f32 %v787_v33, %v667_v25  ;;  %v794_v62 = vmul.f32 %v2115_v59, %v2281_v9  ;;  %v796_v15 = vmul.f32 %v2119_v4, %v2281_v9  ;;  %v617_v16 = vmul.f32 %v2110_v50, %v2267_v30 }
  0xac   : > { %v619_v37 = vmul.f32 %v2123_v6, %v2267_v30  ;;  %v850_v24 = vmax.f32 %v818_v8, 0.0  ;;  %v852_v25 = vmax.f32 %v820_v55, 0.0  ;;  %v793_v63 = vmul.f32 %v2121_v5, %v2281_v9 }
  0xad   : > { %v795_v0 = vmul.f32 %v2125_v7, %v2281_v9  ;;  %v826_v1 = vadd.f32 %v794_v62, %v674_v45  ;;  %v828_v33 = vadd.f32 %v796_v15, %v676_v36  ;;  %v849_v21 = vmax.f32 %v817_v49, 0.0  ;;  %v2299_v13 = vpop.permute.xlu0 %686 }
  0xae   : > { %v851_v20 = vmax.f32 %v819_v38, 0.0  ;;  %v825_v58 = vadd.f32 %v793_v63, %v673_v52  ;;  %v650_v57 = vadd.f32 %v618_v27, %v498_v42  ;;  %v652_v10 = vadd.f32 %v620_v39, %v500_v47 }
  0xaf   : > { %v827_v22 = vadd.f32 %v795_v0, %v675_v53  ;;  %v2301_v12 = vpop.permute.xlu1 %484  ;;  %v858_v8 = vmax.f32 %v826_v1, 0.0  ;;  %v860_v55 = vmax.f32 %v828_v33, 0.0  ;;  %v778_v30 = vmul.f32 %v2115_v59, %v2299_v13 }
  0xb0   : > { %v780_v40 = vmul.f32 %v2119_v4, %v2299_v13  ;;  %v857_v45 = vmax.f32 %v825_v58, 0.0  ;;  %v506_v49 = vadd.f32 %v2301_v12, %v2188_v11  ;;  %v777_v52 = vmul.f32 %v2121_v5, %v2299_v13 }
  0xb1   : > { %v859_v36 = vmax.f32 %v827_v22, 0.0  ;;  %v878_v53 = vpack.c.bf16 %v858_v8, %v850_v24  ;;  %v880_v42 = vpack.c.bf16 %v860_v55, %v852_v25  ;;  %v508_v47 = vadd.f32 %v2301_v12, %v2191_v17 }
  0xb2   : > { %v505_v38 = vadd.f32 %v2301_v12, %v2204_v46  ;;  %v877_v27 = vpack.c.bf16 %v857_v45, %v849_v21  ;;  %v507_v58 = vadd.f32 %v2301_v12, %v2207_v51  ;;  %v779_v22 = vmul.f32 %v2125_v7, %v2299_v13 }
  0xb3   : > { %v879_v39 = vpack.c.bf16 %v859_v36, %v851_v20  ;;  %938 = vmatprep.subr.bf16.mxu0 %v878_v53  ;;  %991 = vmatprep.subr.bf16.mxu1 %v880_v42  ;;  %v670_v11 = vadd.f32 %v638_v14, %v2171_v41  ;;  %v790_v62 = vmul.f32 %v2143_v18, %v2251_v28 }
  0xb4   : > { %v798_v17 = vmul.f32 %v2143_v18, %v2281_v9  ;;  %v2324_v15 = vpop.permute.xlu1 %534  ;;  %939 = vmatpush1.bf16.msra.mxu0 %v877_v27  ;;  %v672_v20 = vadd.f32 %v640_v3, %v2173_v44  ;;  %v792_v21 = vmul.f32 %v2145_v19, %v2251_v28  ;;  %v800_v46 = vmul.f32 %v2145_v19, %v2281_v9 }
  0xb5   : > { %992 = vmatpush1.bf16.msra.mxu1 %v879_v39  ;;  %v626_v41 = vmul.f32 %v2100_v43, %v2324_v15  ;;  %v628_v51 = vmul.f32 %v2105_v48, %v2324_v15  ;;  %v625_v14 = vmul.f32 %v2110_v50, %v2324_v15  ;;  %v627_v24 = vmul.f32 %v2123_v6, %v2324_v15 }
  0xb6   : > { %v822_v25 = vadd.f32 %v790_v62, %v670_v11  ;;  %v830_v44 = vadd.f32 %v798_v17, %v2209_v54  ;;  %v824_v3 = vadd.f32 %v792_v21, %v672_v20  ;;  %v832_v63 = vadd.f32 %v800_v46, %v2211_v56 }
  0xb7   : > { %v658_v0 = vadd.f32 %v626_v41, %v506_v49  ;;  %v660_v1 = vadd.f32 %v628_v51, %v508_v47  ;;  %v657_v33 = vadd.f32 %v625_v14, %v505_v38  ;;  %v659_v8 = vadd.f32 %v627_v24, %v507_v58 }
  0xb8   : > { %v649_v43 = vadd.f32 %v617_v16, %v2254_v34  ;;  %v651_v48 = vadd.f32 %v619_v37, %v2257_v35  ;;  %v854_v55 = vmax.f32 %v822_v25, 0.0  ;;  %v862_v45 = vmax.f32 %v830_v44, 0.0  ;;  %v2673_v25 = vld [vmem:[#allocation21_spill] sm:$0xff]  ;;  %v2674_v44 = vld [vmem:[#allocation8_spill] sm:$0xff] }
  0xb9   : > { %v2343_v50 = vpop.permute.xlu1 %682  ;;  %v810_v36 = vadd.f32 %v778_v30, %v658_v0  ;;  %v812_v6 = vadd.f32 %v780_v40, %v660_v1  ;;  %v809_v53 = vadd.f32 %v777_v52, %v657_v33  ;;  %v811_v42 = vadd.f32 %v779_v22, %v659_v8  ;;  %v2676_v0 = vld [vmem:[#allocation14_spill] sm:$0xff] }
  0xba   : > { %v770_v54 = vmul.f32 %v2115_v59, %v2343_v50  ;;  %v772_v56 = vmul.f32 %v2119_v4, %v2343_v50  ;;  %v769_v49 = vmul.f32 %v2121_v5, %v2343_v50  ;;  %v771_v34 = vmul.f32 %v2125_v7, %v2343_v50 }
  0xbb   : > { %v842_v35 = vmax.f32 %v810_v36, 0.0  ;;  %v844_v16 = vmax.f32 %v812_v6, 0.0  ;;  %v856_v37 = vmax.f32 %v824_v3, 0.0  ;;  %v864_v47 = vmax.f32 %v832_v63, 0.0  ;;  %v2677_v6 = vld [vmem:[#allocation16_spill] sm:$0xff] }
  0xbc   : > { %v802_v30 = vadd.f32 %v770_v54, %v650_v57  ;;  %v804_v40 = vadd.f32 %v772_v56, %v652_v10  ;;  %v801_v52 = vadd.f32 %v769_v49, %v649_v43  ;;  %v803_v38 = vadd.f32 %v771_v34, %v651_v48  ;;  %v2678_v54 = vld [vmem:[#allocation15_spill] sm:$0xff]  ;;  %v2679_v49 = vld [vmem:[#allocation9_spill] sm:$0xff] }
  0xbd   : > { %v841_v27 = vmax.f32 %v809_v53, 0.0  ;;  %v843_v59 = vmax.f32 %v811_v42, 0.0  ;;  %v669_v4 = vadd.f32 %v2276_v23, %v2183_v60  ;;  %v789_v5 = vmul.f32 %v2157_v29, %v2251_v28 }
  0xbe   : > { %v834_v39 = vmax.f32 %v802_v30, 0.0  ;;  %v836_v58 = vmax.f32 %v804_v40, 0.0  ;;  %v833_v7 = vmax.f32 %v801_v52, 0.0  ;;  %v835_v22 = vmax.f32 %v803_v38, 0.0  ;;  %v2680_v52 = vld [vmem:[#allocation19_spill] sm:$0xff] }
  0xbf   : > { %v797_v11 = vmul.f32 %v2157_v29, %v2281_v9  ;;  %v821_v62 = vadd.f32 %v789_v5, %v669_v4  ;;  %v671_v10 = vadd.f32 %v2279_v31, %v2185_v61  ;;  %v791_v57 = vmul.f32 %v2159_v32, %v2251_v28  ;;  %v2369_v61 = vld [vmem:[%s2631_s3] sm:$0xff]   ;;  %v2682_v5 = vld [vmem:[#allocation17_spill] sm:$0xff] }
  0xc0   : > { %v870_v17 = vpack.c.bf16 %v842_v35, %v834_v39  ;;  %v872_v20 = vpack.c.bf16 %v844_v16, %v836_v58  ;;  %v869_v60 = vpack.c.bf16 %v841_v27, %v833_v7  ;;  %v871_v23 = vpack.c.bf16 %v843_v59, %v835_v22  ;;  %v2672_v31 = vld [vmem:[#allocation12_spill] sm:$0xff]  ;;  %v2683_v58 = vld [vmem:[#allocation10_spill] sm:$0xff] }
  0xc1   : > { %v882_v21 = vpack.c.bf16 %v862_v45, %v854_v55  ;;  %v829_v46 = vadd.f32 %v797_v11, %v2213_v26  ;;  %v799_v41 = vmul.f32 %v2159_v32, %v2281_v9  ;;  %v823_v51 = vadd.f32 %v791_v57, %v671_v10  ;;  %v2675_v9 = vld [vmem:[#allocation13_spill] sm:$0xff] }
  0xc2   : > { %940 = vmatprep.subr.bf16.mxu0 %v870_v17  ;;  %993 = vmatprep.subr.bf16.mxu1 %v872_v20  ;;  %v884_v14 = vpack.c.bf16 %v864_v47, %v856_v37  ;;  %v853_v28 = vmax.f32 %v821_v62, 0.0  ;;  %v502_v24 = vadd.f32 %v2672_v31, %v2228_v2  ;;  %v622_v3 = vmul.f32 %v2674_v44, %v2673_v25  ;;  %v1842_v10 = vld [vmem:[%s2631_s3 + $0x8] sm:$0xff]  }
  0xc3   : > { %941 = vmatpush1.bf16.msra.mxu0 %v869_v60  ;;  %994 = vmatpush1.bf16.msra.mxu1 %v871_v23  ;;  %v861_v26 = vmax.f32 %v829_v46, 0.0  ;;  %v831_v63 = vadd.f32 %v799_v41, %v2675_v9  ;;  %v510_v1 = vadd.f32 %v2301_v12, %v2676_v0  ;;  %v630_v33 = vmul.f32 %v2674_v44, %v2324_v15  ;;  %v2684_v60 = vld [vmem:[#allocation20_spill] sm:$0xff]  ;;  %v2685_v41 = vld [vmem:[#allocation18_spill] sm:$0xff] }
  0xc4   : > { %1044 = vmatprep.subr.bf16.mxu0 %v882_v21  ;;  %1097 = vmatprep.subr.bf16.mxu1 %v884_v14  ;;  %v855_v8 = vmax.f32 %v823_v51, 0.0  ;;  %v654_v43 = vadd.f32 %v622_v3, %v502_v24  ;;  %v774_v2 = vmul.f32 %v2143_v18, %v2343_v50  ;;  %v782_v48 = vmul.f32 %v2143_v18, %v2299_v13  ;;  %v2686_v14 = vld [vmem:[#allocation11_spill] sm:$0xff] }
  0xc5   : > { %v881_v55 = vpack.c.bf16 %v861_v26, %v853_v28  ;;  %v863_v45 = vmax.f32 %v831_v63, 0.0  ;;  %v662_v36 = vadd.f32 %v630_v33, %v510_v1  ;;  %v504_v53 = vadd.f32 %v2672_v31, %v2677_v6 }
  0xc6   : > { %1762 = vmatmul.mubr.msk.bf16.vlgmr.msra.gmra.mxu0 %vm919_vm0, %v2369_v61  ;;  %1764 = vmatmul.mubr.msk.bf16.vlgmr.msra.gmra.mxu1 %vm919_vm0, %v2369_v61  ;;  %v806_v42 = vadd.f32 %v774_v2, %v654_v43  ;;  %v512_v56 = vadd.f32 %v2301_v12, %v2678_v54  ;;  %v624_v34 = vmul.f32 %v2679_v49, %v2673_v25  ;;  %v2681_v27 = vmov 0  }
  0xc7   : > { %1045 = vmatpush1.bf16.msra.mxu0 %v881_v55  ;;  %v883_v18 = vpack.c.bf16 %v863_v45, %v855_v8  ;;  %v814_v35 = vadd.f32 %v782_v48, %v662_v36  ;;  %v632_v16 = vmul.f32 %v2679_v49, %v2324_v15  ;;  %v776_v37 = vmul.f32 %v2145_v19, %v2343_v50 }
  0xc8   : > { %v838_v47 = vmax.f32 %v806_v42, 0.0  ;;  %v656_v30 = vadd.f32 %v624_v34, %v504_v53  ;;  %v784_v40 = vmul.f32 %v2145_v19, %v2299_v13  ;;  %v501_v38 = vadd.f32 %v2672_v31, %v2680_v52  ;;  %968 = vmatprep.mubr.bf16.mxu0 %v2681_v27  ;;  %1021 = vmatprep.mubr.bf16.mxu1 %v2681_v27 }
  0xc9   : > { %1098 = vmatpush1.bf16.msra.mxu1 %v883_v18  ;;  %v846_v59 = vmax.f32 %v814_v35, 0.0  ;;  %v664_v4 = vadd.f32 %v632_v16, %v512_v56  ;;  %v509_v39 = vadd.f32 %v2301_v12, %v2682_v5  ;;  %v621_v7 = vmul.f32 %v2683_v58, %v2673_v25 }
  0xca   : > { %v808_v22 = vadd.f32 %v776_v37, %v656_v30  ;;  %v629_v19 = vmul.f32 %v2683_v58, %v2324_v15  ;;  %v773_v11 = vmul.f32 %v2157_v29, %v2343_v50  ;;  %v781_v62 = vmul.f32 %v2157_v29, %v2299_v13 }
  0xcb   : > { %v874_v57 = vpack.c.bf16 %v846_v59, %v838_v47  ;;  %v816_v17 = vadd.f32 %v784_v40, %v664_v4  ;;  %v653_v20 = vadd.f32 %v621_v7, %v501_v38  ;;  %v503_v23 = vadd.f32 %v2672_v31, %v2684_v60  ;;  %v2451_v47 = vpop.permute.xlu0 %891 }
  0xcc   : > { %v840_v21 = vmax.f32 %v808_v22, 0.0  ;;  %v661_v46 = vadd.f32 %v629_v19, %v509_v39  ;;  %v511_v51 = vadd.f32 %v2301_v12, %v2685_v41  ;;  %v623_v28 = vmul.f32 %v2686_v14, %v2673_v25 }
  0xcd   : > { %1046 = vmatprep.subr.bf16.mxu0 %v874_v57  ;;  %v848_v29 = vmax.f32 %v816_v17, 0.0  ;;  %v805_v24 = vadd.f32 %v773_v11, %v653_v20  ;;  %v631_v44 = vmul.f32 %v2686_v14, %v2324_v15  ;;  %v775_v3 = vmul.f32 %v2159_v32, %v2343_v50 }
  0xce   : > { %v813_v26 = vadd.f32 %v781_v62, %v661_v46  ;;  %v655_v9 = vadd.f32 %v623_v28, %v503_v23  ;;  %v783_v31 = vmul.f32 %v2159_v32, %v2299_v13  ;;  %1763 = vmatmul.mubr.msk.bf16.gmra.mxu0 %vm919_vm0, %v1842_v10  ;;  %1765 = vmatmul.mubr.msk.bf16.gmra.mxu1 %vm919_vm0, %v1842_v10  ;;  %v2443_v32 = vpop.permute.xlu1 %901 }
  0xcf   : > { %v876_v12 = vpack.c.bf16 %v848_v29, %v840_v21  ;;  %v837_v25 = vmax.f32 %v805_v24, 0.0  ;;  %v663_v63 = vadd.f32 %v631_v44, %v511_v51  ;;  %1064 = vmatprep.mubr.bf16.mxu0 %v2681_v27  ;;  %1117 = vmatprep.mubr.bf16.mxu1 %v2681_v27 }
  0xd0   : > { %v845_v15 = vmax.f32 %v813_v26, 0.0  ;;  %v807_v0 = vadd.f32 %v775_v3, %v655_v9 }
  0xd1   : > { %1099 = vmatprep.subr.bf16.mxu1 %v876_v12  ;;  %v815_v50 = vadd.f32 %v783_v31, %v663_v63 }
  0xd2   : > { %v873_v1 = vpack.c.bf16 %v845_v15, %v837_v25  ;;  %v839_v33 = vmax.f32 %v807_v0, 0.0  ;;  %v2445_v6 = vpop.permute.xlu1 %906 }
  0xd3   : > { %v847_v8 = vmax.f32 %v815_v50, 0.0 }
  0xd4   : > { %1047 = vmatpush1.bf16.msra.mxu0 %v873_v1 }
  0xd5   : > { %v875_v13 = vpack.c.bf16 %v847_v8, %v839_v33 }
  0xd6   : > { %v2447_v34 = vpop.permute.xlu1 %896 }
  0xd7   : > { %1100 = vmatpush1.bf16.msra.mxu1 %v875_v13  ;;  %1766 = vmatmul.mubr.msk.bf16.vlgmr.msra.gmra.mxu0 %vm919_vm0, %v2369_v61 }
  0xd8   : > { %1074 = vmatprep.mubr.bf16.mxu0 %v2681_v27 }
  0xda   : > { %1768 = vmatmul.mubr.msk.bf16.vlgmr.msra.gmra.mxu1 %vm919_vm0, %v2369_v61 }
  0xdb   : > { %1127 = vmatprep.mubr.bf16.mxu1 %v2681_v27 }
  0xdf   : > { %1767 = vmatmul.mubr.msk.bf16.gmra.mxu0 %vm919_vm0, %v1842_v10 }
  0xe0   : > { %1262 = vmatprep.mubr.bf16.mxu0 %v2681_v27 }
  0xe2   : > { %1769 = vmatmul.mubr.msk.bf16.gmra.mxu1 %vm919_vm0, %v1842_v10 }
  0xe3   : > { %1315 = vmatprep.mubr.bf16.mxu1 %v2681_v27 }
 0x186   : > { %v960_v43 = vpop.f32.mrf.mxu0  ;;  %v1013_v2 = vpop.f32.mrf.mxu1 }
 0x187   : > { %v961_v51 = vadd.f32 %v960_v43, %v2451_v47  ;;  %v1014_v14 = vadd.f32 %v1013_v2, %v2451_v47 }
 0x188   : > { %v962_v48 = vpop.f32.mrf.mxu0  ;;  %v1015_v55 = vpop.f32.mrf.mxu1 }
 0x189   : > { %v963_v59 = vadd.f32 %v962_v48, %v2451_v47  ;;  %v1016_v4 = vadd.f32 %v1015_v55, %v2451_v47  ;;  %v1138_v33 = vmax.f32 %v961_v51, 0.0  ;;  %v1140_v8 = vmax.f32 %v1014_v14, 0.0 }
 0x18a   : > { %v964_v45 = vpop.f32.mrf.mxu0  ;;  %v1017_v36 = vpop.f32.mrf.mxu1 }
 0x18b   : > { %v965_v22 = vadd.f32 %v964_v45, %v2447_v34  ;;  %v1018_v19 = vadd.f32 %v1017_v36, %v2447_v34  ;;  %v1139_v24 = vmax.f32 %v963_v59, 0.0  ;;  %v1141_v44 = vmax.f32 %v1016_v4, 0.0  ;;  %v2472_v36 = vld [vmem:[%s2633_s5] sm:$0xff]  }
 0x18c   : > { %v966_v61 = vpop.f32.mrf.mxu0  ;;  %v1019_v53 = vpop.f32.mrf.mxu1 }
 0x18d   : > { %v967_v18 = vadd.f32 %v966_v61, %v2447_v34  ;;  %v1020_v35 = vadd.f32 %v1019_v53, %v2447_v34  ;;  %v1146_v31 = vmax.f32 %v965_v22, 0.0  ;;  %v1148_v12 = vmax.f32 %v1018_v19, 0.0 }
 0x18e   : > { %v970_v42 = vpop.f32.mrf.mxu0  ;;  %v1023_v54 = vpop.f32.mrf.mxu1 }
 0x18f   : > { %v971_v5 = vadd.f32 %v970_v42, %v2443_v32  ;;  %v1024_v39 = vadd.f32 %v1023_v54, %v2443_v32  ;;  %v1147_v10 = vmax.f32 %v967_v18, 0.0  ;;  %v1149_v57 = vmax.f32 %v1020_v35, 0.0 }
 0x190   : > { %v972_v56 = vpop.f32.mrf.mxu0  ;;  %v1025_v49 = vpop.f32.mrf.mxu1  ;;  %v1174_v2 = vpack.c.bf16 %v1146_v31, %v1138_v33  ;;  %v1176_v48 = vpack.c.bf16 %v1148_v12, %v1140_v8 }
 0x191   : > { %v973_v30 = vadd.f32 %v972_v56, %v2443_v32  ;;  %v1026_v40 = vadd.f32 %v1025_v49, %v2443_v32  ;;  %v1154_v28 = vmax.f32 %v971_v5, 0.0  ;;  %v1156_v29 = vmax.f32 %v1024_v39, 0.0 }
 0x192   : > { %v974_v16 = vpop.f32.mrf.mxu0  ;;  %v1027_v37 = vpop.f32.mrf.mxu1  ;;  %v1175_v0 = vpack.c.bf16 %v1147_v10, %v1139_v24  ;;  %v1177_v50 = vpack.c.bf16 %v1149_v57, %v1141_v44 }
 0x193   : > { %v975_v52 = vadd.f32 %v974_v16, %v2445_v6  ;;  %v1028_v38 = vadd.f32 %v1027_v37, %v2445_v6  ;;  %v1155_v60 = vmax.f32 %v973_v30, 0.0  ;;  %v1157_v23 = vmax.f32 %v1026_v40, 0.0 }
 0x194   : > { %v976_v58 = vpop.f32.mrf.mxu0  ;;  %v1029_v7 = vpop.f32.mrf.mxu1 }
 0x195   : > { %v977_v11 = vadd.f32 %v976_v58, %v2445_v6  ;;  %v1030_v62 = vadd.f32 %v1029_v7, %v2445_v6  ;;  %v1162_v17 = vmax.f32 %v975_v52, 0.0  ;;  %v1164_v20 = vmax.f32 %v1028_v38, 0.0  ;;  %v1844_v7 = vld [vmem:[%s2633_s5 + $0x8] sm:$0xff]  }
 0x197   : > { %v1163_v21 = vmax.f32 %v977_v11, 0.0  ;;  %v1165_v46 = vmax.f32 %v1030_v62, 0.0  ;;  %v1066_v41 = vpop.f32.mrf.mxu0  ;;  %v1182_v25 = vpack.c.bf16 %v1162_v17, %v1154_v28  ;;  %v1184_v63 = vpack.c.bf16 %v1164_v20, %v1156_v29 }
 0x198   : > { %v1067_v40 = vadd.f32 %v1066_v41, %v2451_v47 }
 0x199   : > { %v1183_v3 = vpack.c.bf16 %v1163_v21, %v1155_v60  ;;  %v1185_v26 = vpack.c.bf16 %v1165_v46, %v1157_v23  ;;  %v1068_v9 = vpop.f32.mrf.mxu0 }
 0x19a   : > { %v2467_v15 = vpop.f32.mrf.mxu1  ;;  %v1069_v16 = vadd.f32 %v1068_v9, %v2451_v47 }
 0x19b   : > { %v1070_v1 = vpop.f32.mrf.mxu0  ;;  %1242 = vmatprep.subr.bf16.mxu0 %v1183_v3  ;;  %1295 = vmatprep.subr.bf16.mxu1 %v1185_v26 }
 0x19c   : > { %v1121_v13 = vpop.f32.mrf.mxu1  ;;  %1243 = vmatpush1.bf16.msra.mxu0 %v1182_v25  ;;  %1296 = vmatpush1.bf16.msra.mxu1 %v1184_v63  ;;  %v1071_v52 = vadd.f32 %v1070_v1, %v2447_v34  ;;  %v1143_v57 = vmax.f32 %v1069_v16, 0.0  ;;  %v2512_v63 = vpop.permute.xlu1 %1196 }
 0x19d   : > { %v1072_v43 = vpop.f32.mrf.mxu0  ;;  %1244 = vmatprep.subr.bf16.mxu0 %v1175_v0  ;;  %1297 = vmatprep.subr.bf16.mxu1 %v1177_v50  ;;  %v1122_v17 = vadd.f32 %v1121_v13, %v2451_v47 }
 0x19e   : > { %v1123_v55 = vpop.f32.mrf.mxu1  ;;  %v1073_v56 = vadd.f32 %v1072_v43, %v2447_v34  ;;  %v1150_v23 = vmax.f32 %v1071_v52, 0.0 }
 0x19f   : > { %v1076_v45 = vpop.f32.mrf.mxu0  ;;  %v1124_v21 = vadd.f32 %v1123_v55, %v2447_v34 }
 0x1a0   : > { %v1125_v61 = vpop.f32.mrf.mxu1  ;;  %1245 = vmatpush1.bf16.msra.mxu0 %v1174_v2  ;;  %1298 = vmatpush1.bf16.msra.mxu1 %v1176_v48  ;;  %v1077_v37 = vadd.f32 %v1076_v45, %v2443_v32  ;;  %v1151_v22 = vmax.f32 %v1073_v56, 0.0  ;;  %v2516_v0 = vpop.permute.xlu1 %1206 }
 0x1a1   : > { %v1078_v53 = vpop.f32.mrf.mxu0  ;;  %v1126_v4 = vadd.f32 %v1125_v61, %v2447_v34  ;;  %v1145_v34 = vmax.f32 %v1122_v17, 0.0  ;;  %v1152_v26 = vmax.f32 %v1124_v21, 0.0 }
 0x1a2   : > { %v1129_v42 = vpop.f32.mrf.mxu1  ;;  %v1079_v49 = vadd.f32 %v1078_v53, %v2443_v32  ;;  %v1158_v20 = vmax.f32 %v1077_v37, 0.0  ;;  %v1179_v24 = vpack.c.bf16 %v1151_v22, %v1143_v57 }
 0x1a3   : > { %v1080_v54 = vpop.f32.mrf.mxu0  ;;  %1772 = vmatmul.mubr.msk.bf16.vlgmr.msra.gmra.mxu0 %vm919_vm0, %v2472_v36  ;;  %1774 = vmatmul.mubr.msk.bf16.vlgmr.msra.gmra.mxu1 %vm919_vm0, %v2472_v36  ;;  %v1130_v19 = vadd.f32 %v1129_v42, %v2443_v32  ;;  %v1153_v51 = vmax.f32 %v1126_v4, 0.0 }
 0x1a4   : > { %v1131_v18 = vpop.f32.mrf.mxu1  ;;  %v1081_v35 = vadd.f32 %v1080_v54, %v2445_v6  ;;  %1272 = vmatprep.mubr.bf16.mxu0 %v2681_v27  ;;  %1325 = vmatprep.mubr.bf16.mxu1 %v2681_v27  ;;  %v1159_v11 = vmax.f32 %v1079_v49, 0.0 }
 0x1a5   : > { %v1082_v30 = vpop.f32.mrf.mxu0  ;;  %v1132_v5 = vadd.f32 %v1131_v18, %v2443_v32  ;;  %v1120_v32 = vadd.f32 %v2467_v15, %v2451_v47  ;;  %v1160_v44 = vmax.f32 %v1130_v19, 0.0  ;;  %v1181_v12 = vpack.c.bf16 %v1153_v51, %v1145_v34  ;;  %v2514_v15 = vpop.permute.xlu0 %1201 }
 0x1a6   : > { %v1133_v38 = vpop.f32.mrf.mxu1  ;;  %v1083_v59 = vadd.f32 %v1082_v30, %v2445_v6  ;;  %v1166_v39 = vmax.f32 %v1081_v35, 0.0 }
 0x1a7   : > { %v1134_v58 = vadd.f32 %v1133_v38, %v2445_v6  ;;  %v1161_v14 = vmax.f32 %v1132_v5, 0.0  ;;  %v1144_v25 = vmax.f32 %v1120_v32, 0.0 }
 0x1a8   : > { %v1167_v62 = vmax.f32 %v1083_v59, 0.0  ;;  %v1135_v10 = vpop.f32.mrf.mxu1  ;;  %v1186_v28 = vpack.c.bf16 %v1166_v39, %v1158_v20 }
 0x1a9   : > { %v1136_v60 = vadd.f32 %v1135_v10, %v2445_v6  ;;  %v1168_v46 = vmax.f32 %v1134_v58, 0.0  ;;  %v1142_v6 = vmax.f32 %v1067_v40, 0.0  ;;  %v1180_v47 = vpack.c.bf16 %v1152_v26, %v1144_v25  ;;  %v2520_v2 = vpop.permute.xlu0 %1211 }
 0x1aa   : > { %v1187_v41 = vpack.c.bf16 %v1167_v62, %v1159_v11 }
 0x1ab   : > { %v1169_v29 = vmax.f32 %v1136_v60, 0.0  ;;  %1773 = vmatmul.mubr.msk.bf16.gmra.mxu0 %vm919_vm0, %v1844_v7  ;;  %1775 = vmatmul.mubr.msk.bf16.gmra.mxu1 %vm919_vm0, %v1844_v7  ;;  %v1188_v9 = vpack.c.bf16 %v1168_v46, %v1160_v44  ;;  %v1178_v31 = vpack.c.bf16 %v1150_v23, %v1142_v6 }
 0x1ac   : > { %1348 = vmatprep.subr.bf16.mxu0 %v1187_v41  ;;  %1368 = vmatprep.mubr.bf16.mxu0 %v2681_v27 }
 0x1ad   : > { %v1189_v3 = vpack.c.bf16 %v1169_v29, %v1161_v14  ;;  %1349 = vmatpush1.bf16.msra.mxu0 %v1186_v28  ;;  %1421 = vmatprep.mubr.bf16.mxu1 %v2681_v27  ;;  %v2530_v59 = vpop.permute.xlu0 %1485 }
 0x1ae   : > { %1350 = vmatprep.subr.bf16.mxu0 %v1179_v24 }
 0x1af   : > { %1401 = vmatprep.subr.bf16.mxu1 %v1189_v3 }
 0x1b0   : > { %1402 = vmatpush1.bf16.msra.mxu1 %v1188_v9 }
 0x1b1   : > { %1403 = vmatprep.subr.bf16.mxu1 %v1181_v12  ;;  %1351 = vmatpush1.bf16.msra.mxu0 %v1178_v31 }
 0x1b4   : > { %1404 = vmatpush1.bf16.msra.mxu1 %v1180_v47  ;;  %1776 = vmatmul.mubr.msk.bf16.vlgmr.msra.gmra.mxu0 %vm919_vm0, %v2472_v36 }
 0x1b5   : > { %1378 = vmatprep.mubr.bf16.mxu0 %v2681_v27 }
 0x1b7   : > { %1778 = vmatmul.mubr.msk.bf16.vlgmr.msra.gmra.mxu1 %vm919_vm0, %v2472_v36  ;;  %v2524_v36 = vpop.permute.xlu1 %1480 }
 0x1b8   : > { %1431 = vmatprep.mubr.bf16.mxu1 %v2681_v27 }
 0x1bb   : > { %v2536_v62 = vpop.permute.xlu1 %1490 }
 0x1bc   : > { %1777 = vmatmul.mubr.msk.bf16.gmra.mxu0 %vm919_vm0, %v1844_v7 }
 0x1bf   : > { %1779 = vmatmul.mubr.msk.bf16.gmra.mxu1 %vm919_vm0, %v1844_v7 }
 0x263   : > { %v1264_v50 = vpop.f32.mrf.mxu0  ;;  %v1317_v1 = vpop.f32.mrf.mxu1 }
 0x264   : > { %v1265_v33 = vadd.f32 %v1264_v50, %v2512_v63  ;;  %v1318_v8 = vadd.f32 %v1317_v1, %v2512_v63 }
 0x265   : > { %v1266_v13 = vpop.f32.mrf.mxu0  ;;  %v1319_v43 = vpop.f32.mrf.mxu1 }
 0x266   : > { %v1267_v27 = vadd.f32 %v1266_v13, %v2512_v63  ;;  %v1320_v48 = vadd.f32 %v1319_v43, %v2512_v63  ;;  %v1442_v61 = vmax.f32 %v1265_v33, 0.0  ;;  %v1444_v53 = vmax.f32 %v1318_v8, 0.0  ;;  %v2554_v8 = vpop.permute.xlu0 %1495 }
 0x267   : > { %v1268_v55 = vpop.f32.mrf.mxu0  ;;  %v1321_v45 = vpop.f32.mrf.mxu1 }
 0x268   : > { %v1269_v42 = vadd.f32 %v1268_v55, %v2514_v15  ;;  %v1322_v54 = vadd.f32 %v1321_v45, %v2514_v15  ;;  %v1443_v16 = vmax.f32 %v1267_v27, 0.0  ;;  %v1445_v37 = vmax.f32 %v1320_v48, 0.0 }
 0x269   : > { %v1270_v56 = vpop.f32.mrf.mxu0  ;;  %v1323_v49 = vpop.f32.mrf.mxu1  ;;  %v1498_v7 = vmul.f32 %v2524_v36, %v1442_v61  ;;  %v1500_v22 = vmul.f32 %v2524_v36, %v1444_v53 }
 0x26a   : > { %v1271_v18 = vadd.f32 %v1270_v56, %v2514_v15  ;;  %v1324_v35 = vadd.f32 %v1323_v49, %v2514_v15  ;;  %v1450_v30 = vmax.f32 %v1269_v42, 0.0  ;;  %v1452_v40 = vmax.f32 %v1322_v54, 0.0 }
 0x26b   : > { %v1274_v52 = vpop.f32.mrf.mxu0  ;;  %v1327_v38 = vpop.f32.mrf.mxu1  ;;  %v1499_v60 = vmul.f32 %v2524_v36, %v1443_v16  ;;  %v1501_v23 = vmul.f32 %v2524_v36, %v1445_v37 }
 0x26c   : > { %v1451_v4 = vmax.f32 %v1271_v18, 0.0  ;;  %v1453_v5 = vmax.f32 %v1324_v35, 0.0  ;;  %v1275_v39 = vadd.f32 %v1274_v52, %v2516_v0  ;;  %v1328_v58 = vadd.f32 %v1327_v38, %v2516_v0 }
 0x26d   : > { %v1276_v19 = vpop.f32.mrf.mxu0  ;;  %v1329_v11 = vpop.f32.mrf.mxu1  ;;  %v1506_v10 = vmul.f32 %v2530_v59, %v1450_v30  ;;  %v1508_v57 = vmul.f32 %v2530_v59, %v1452_v40 }
 0x26e   : > { %v1458_v17 = vmax.f32 %v1275_v39, 0.0  ;;  %v1460_v20 = vmax.f32 %v1328_v58, 0.0  ;;  %v1277_v21 = vadd.f32 %v1276_v19, %v2516_v0  ;;  %v1330_v46 = vadd.f32 %v1329_v11, %v2516_v0 }
 0x26f   : > { %v1278_v41 = vpop.f32.mrf.mxu0  ;;  %v1331_v51 = vpop.f32.mrf.mxu1  ;;  %v1507_v14 = vmul.f32 %v2530_v59, %v1451_v4  ;;  %v1509_v28 = vmul.f32 %v2530_v59, %v1453_v5  ;;  %v1530_v9 = vadd.f32 %v1506_v10, %v1498_v7  ;;  %v1548_v31 = vadd.f32 %v1508_v57, %v1500_v22 }
 0x270   : > { %v1514_v29 = vmul.f32 %v2536_v62, %v1458_v17  ;;  %v1516_v32 = vmul.f32 %v2536_v62, %v1460_v20  ;;  %v1459_v24 = vmax.f32 %v1277_v21, 0.0  ;;  %v1461_v44 = vmax.f32 %v1330_v46, 0.0 }
 0x271   : > { %v1279_v6 = vadd.f32 %v1278_v41, %v2520_v2  ;;  %v1332_v34 = vadd.f32 %v1331_v51, %v2520_v2  ;;  %v1280_v3 = vpop.f32.mrf.mxu0  ;;  %v1333_v26 = vpop.f32.mrf.mxu1  ;;  %v1539_v13 = vadd.f32 %v1507_v14, %v1499_v60  ;;  %v1557_v43 = vadd.f32 %v1509_v28, %v1501_v23 }
 0x272   : > { %v1281_v12 = vadd.f32 %v1280_v3, %v2520_v2  ;;  %v1334_v25 = vadd.f32 %v1333_v26, %v2520_v2  ;;  %v1515_v47 = vmul.f32 %v2536_v62, %v1459_v24  ;;  %v1517_v50 = vmul.f32 %v2536_v62, %v1461_v44 }
 0x273   : > { %v1466_v1 = vmax.f32 %v1279_v6, 0.0  ;;  %v1468_v33 = vmax.f32 %v1332_v34, 0.0  ;;  %v1531_v45 = vadd.f32 %v1530_v9, %v1514_v29  ;;  %v1549_v61 = vadd.f32 %v1548_v31, %v1516_v32 }
 0x274   : > { %v1467_v27 = vmax.f32 %v1281_v12, 0.0  ;;  %v1469_v48 = vmax.f32 %v1334_v25, 0.0  ;;  %v1370_v55 = vpop.f32.mrf.mxu0  ;;  %v1540_v54 = vadd.f32 %v1539_v13, %v1515_v47  ;;  %v1558_v56 = vadd.f32 %v1557_v43, %v1517_v50 }
 0x275   : > { %v1522_v53 = vmul.f32 %v2554_v8, %v1466_v1  ;;  %v1524_v42 = vmul.f32 %v2554_v8, %v1468_v33  ;;  %v1371_v11 = vadd.f32 %v1370_v55, %v2512_v63 }
 0x276   : > { %v1523_v49 = vmul.f32 %v2554_v8, %v1467_v27  ;;  %v1525_v18 = vmul.f32 %v2554_v8, %v1469_v48  ;;  %v1372_v35 = vpop.f32.mrf.mxu0 }
 0x277   : > { %v1532_v16 = vadd.f32 %v1531_v45, %v1522_v53  ;;  %v1550_v37 = vadd.f32 %v1549_v61, %v1524_v42  ;;  %v1423_v30 = vpop.f32.mrf.mxu1  ;;  %v1373_v57 = vadd.f32 %v1372_v35, %v2512_v63  ;;  %v1446_v44 = vmax.f32 %v1371_v11, 0.0 }
 0x278   : > { %v1541_v40 = vadd.f32 %v1540_v54, %v1523_v49  ;;  %v1559_v52 = vadd.f32 %v1558_v56, %v1525_v18  ;;  %v1374_v38 = vpop.f32.mrf.mxu0  ;;  %v1424_v10 = vadd.f32 %v1423_v30, %v2512_v63 }
 0x279   : > { %v1533_v4 = vrot.slane %v1532_v16, 4  ;;  %v1551_v5 = vrot.slane %v1550_v37, 4  ;;  %v1425_v39 = vpop.f32.mrf.mxu1  ;;  %v1375_v58 = vadd.f32 %v1374_v38, %v2514_v15  ;;  %v1447_v34 = vmax.f32 %v1373_v57, 0.0 }
 0x27a   : > { %v1542_v7 = vrot.slane %v1541_v40, 4  ;;  %v1560_v22 = vrot.slane %v1559_v52, 4  ;;  %v1376_v19 = vpop.f32.mrf.mxu0  ;;  %v1426_v41 = vadd.f32 %v1425_v39, %v2512_v63  ;;  %v1448_v6 = vmax.f32 %v1424_v10, 0.0 }
 0x27b   : > { %v1427_v17 = vpop.f32.mrf.mxu1  ;;  %v1534_v20 = vadd.f32 %v1533_v4, %v1532_v16  ;;  %v1552_v60 = vadd.f32 %v1551_v5, %v1550_v37  ;;  %v1454_v51 = vmax.f32 %v1375_v58, 0.0  ;;  %v1377_v32 = vadd.f32 %v1376_v19, %v2514_v15 }
 0x27c   : > { %v1543_v23 = vadd.f32 %v1542_v7, %v1541_v40  ;;  %v1380_v21 = vpop.f32.mrf.mxu0  ;;  %v1561_v46 = vadd.f32 %v1560_v22, %v1559_v52  ;;  %v1428_v14 = vadd.f32 %v1427_v17, %v2514_v15  ;;  %v1449_v47 = vmax.f32 %v1426_v41, 0.0 }
 0x27d   : > { %v1429_v28 = vpop.f32.mrf.mxu1  ;;  %v1535_v9 = vrot.slane %v1534_v20, 2  ;;  %v1553_v31 = vrot.slane %v1552_v60, 2  ;;  %v1455_v12 = vmax.f32 %v1377_v32, 0.0  ;;  %v1510_v63 = vmul.f32 %v2530_v59, %v1454_v51 }
 0x27e   : > { %v1544_v29 = vrot.slane %v1543_v23, 2  ;;  %v1382_v24 = vpop.f32.mrf.mxu0  ;;  %v1456_v3 = vmax.f32 %v1428_v14, 0.0  ;;  %v1562_v25 = vrot.slane %v1561_v46, 2  ;;  %v1430_v50 = vadd.f32 %v1429_v28, %v2514_v15 }
 0x27f   : > { %v1433_v26 = vpop.f32.mrf.mxu1  ;;  %v1381_v27 = vadd.f32 %v1380_v21, %v2516_v0  ;;  %v1502_v48 = vmul.f32 %v2524_v36, %v1446_v44  ;;  %v1504_v55 = vmul.f32 %v2524_v36, %v1448_v6  ;;  %v1503_v45 = vmul.f32 %v2524_v36, %v1447_v34 }
 0x280   : > { %v1384_v33 = vpop.f32.mrf.mxu0  ;;  %v1545_v13 = vadd.f32 %v1544_v29, %v1543_v23  ;;  %v1512_v43 = vmul.f32 %v2530_v59, %v1456_v3  ;;  %v1457_v61 = vmax.f32 %v1430_v50, 0.0  ;;  %v1536_v42 = vadd.f32 %v1535_v9, %v1534_v20 }
 0x281   : > { %v1435_v1 = vpop.f32.mrf.mxu1  ;;  %v1554_v54 = vadd.f32 %v1553_v31, %v1552_v60  ;;  %v1511_v56 = vmul.f32 %v2530_v59, %v1455_v12  ;;  %v1462_v15 = vmax.f32 %v1381_v27, 0.0  ;;  %v1563_v49 = vadd.f32 %v1562_v25, %v1561_v46 }
 0x282   : > { %v1505_v18 = vmul.f32 %v2524_v36, %v1449_v47  ;;  %v1566_v35 = vadd.f32 %v1510_v63, %v1502_v48  ;;  %v1434_v16 = vadd.f32 %v1433_v26, %v2516_v0  ;;  %v1386_v37 = vpop.f32.mrf.mxu0  ;;  %v1546_v30 = vrot.slane %v1545_v13, 1  ;;  %v1606_v26 = vpop.permute.xlu1 %1605  ;;  %v2687_v48 = vld [vmem:[#allocation7_spill] sm:$0xff] }
 0x283   : > { %v1437_v53 = vpop.f32.mrf.mxu1  ;;  %v1584_v40 = vadd.f32 %v1512_v43, %v1504_v55  ;;  %v1513_v52 = vmul.f32 %v2530_v59, %v1457_v61  ;;  %v1383_v38 = vadd.f32 %v1382_v24, %v2516_v0  ;;  %v1518_v5 = vmul.f32 %v2536_v62, %v1462_v15 }
 0x284   : > { %v1464_v39 = vmax.f32 %v1434_v16, 0.0  ;;  %v1436_v58 = vadd.f32 %v1435_v1, %v2516_v0  ;;  %v1385_v7 = vadd.f32 %v1384_v33, %v2520_v2  ;;  %v1575_v22 = vadd.f32 %v1511_v56, %v1503_v45 }
 0x285   : > { %v1439_v4 = vpop.f32.mrf.mxu1  ;;  %v1463_v36 = vmax.f32 %v1383_v38, 0.0  ;;  %v1438_v19 = vadd.f32 %v1437_v53, %v2520_v2  ;;  %v1387_v11 = vadd.f32 %v1386_v37, %v2520_v2  ;;  %v1593_v20 = vadd.f32 %v1513_v52, %v1505_v18 }
 0x286   : > { %v1520_v10 = vmul.f32 %v2536_v62, %v1464_v39  ;;  %v1465_v57 = vmax.f32 %v1436_v58, 0.0  ;;  %v1470_v59 = vmax.f32 %v1385_v7, 0.0  ;;  %v1440_v17 = vadd.f32 %v1439_v4, %v2520_v2 }
 0x287   : > { %v1519_v60 = vmul.f32 %v2536_v62, %v1463_v36  ;;  %v1472_v23 = vmax.f32 %v1438_v19, 0.0  ;;  %v1471_v21 = vmax.f32 %v1387_v11, 0.0  ;;  %v1567_v0 = vadd.f32 %v1566_v35, %v1518_v5 }
 0x288   : > { %v1521_v46 = vmul.f32 %v2536_v62, %v1465_v57  ;;  %v1526_v41 = vmul.f32 %v2554_v8, %v1470_v59  ;;  %v1473_v51 = vmax.f32 %v1440_v17, 0.0  ;;  %v1585_v14 = vadd.f32 %v1584_v40, %v1520_v10 }
 0x289   : > { %v1576_v28 = vadd.f32 %v1575_v22, %v1519_v60  ;;  %v1528_v29 = vmul.f32 %v2554_v8, %v1472_v23  ;;  %v1527_v32 = vmul.f32 %v2554_v8, %v1471_v21  ;;  %v1564_v24 = vrot.slane %v1563_v49, 1 }
 0x28a   : > { %v1594_v44 = vadd.f32 %v1593_v20, %v1521_v46  ;;  %v1568_v2 = vadd.f32 %v1567_v0, %v1526_v41  ;;  %v1529_v6 = vmul.f32 %v2554_v8, %v1473_v51  ;;  %v1537_v9 = vrot.slane %v1536_v42, 1 }
 0x28b   : > { %v1586_v34 = vadd.f32 %v1585_v14, %v1528_v29  ;;  %v1577_v3 = vadd.f32 %v1576_v28, %v1527_v32  ;;  %v1555_v31 = vrot.slane %v1554_v54, 1  ;;  %v1910_v63 = vmov 1966171168  }
 0x28c   : > { %v1569_v62 = vrot.slane %v1568_v2, 4  ;;  %v1595_v12 = vadd.f32 %v1594_v44, %v1529_v6  ;;  %v1633_v50 = vunpack.c.l.s4 %v1910_v63  ;;  %v1547_v1 = vadd.f32 %v1546_v30, %v1545_v13 }
 0x28d   : > { %v1587_v25 = vrot.slane %v1586_v34, 4  ;;  %v1578_v47 = vrot.slane %v1577_v3, 4  ;;  %v1565_v33 = vadd.f32 %v1564_v24, %v1563_v49  ;;  %v1611_v55 = vrot.slane %v1606_v26, %v2687_v48 }
 0x28e   : > { %v1570_v43 = vadd.f32 %v1569_v62, %v1568_v2  ;;  %v1596_v27 = vrot.slane %v1595_v12, 4  ;;  %v1538_v8 = vadd.f32 %v1537_v9, %v1536_v42  ;;  %v1556_v53 = vadd.f32 %v1555_v31, %v1554_v54  ;;  %v2688_v42 = vld [vmem:[#allocation6_spill] sm:$0xff] }
 0x28f   : > { %v1588_v45 = vadd.f32 %v1587_v25, %v1586_v34  ;;  %v1579_v61 = vadd.f32 %v1578_v47, %v1577_v3  ;;  %v1634_v16 = vunpack.c.0.s8 %v1633_v50  ;;  %v1613_v37 = vadd.f32 %v1611_v55, %v1547_v1 }
 0x290   : > { %v1571_v56 = vrot.slane %v1570_v43, 2  ;;  %v1597_v15 = vadd.f32 %v1596_v27, %v1595_v12  ;;  %v1615_v40 = vadd.f32 %v1611_v55, %v1565_v33  ;;  %v1612_v49 = vadd.f32 %v1611_v55, %v1538_v8 }
 0x291   : > { %v1589_v18 = vrot.slane %v1588_v45, 2  ;;  %v1580_v35 = vrot.slane %v1579_v61, 2  ;;  %v1614_v30 = vadd.f32 %v1611_v55, %v1556_v53  ;;  %v1637_v54 = vsub.s32 %v1634_v16, %v2688_v42 }
 0x292   : > { %v1572_v52 = vadd.f32 %v1571_v56, %v1570_v43  ;;  %v1598_v38 = vrot.slane %v1597_v15, 2  ;;  %v1628_v19 = vcombine.low %v1612_v49, %v1613_v37 }
 0x293   : > { %v1590_v4 = vadd.f32 %v1589_v18, %v1588_v45  ;;  %v1581_v13 = vadd.f32 %v1580_v35, %v1579_v61  ;;  %v1629_v11 = vcombine.low %v1614_v30, %v1615_v40 }
 0x294   : > { %v1573_v5 = vrot.slane %v1572_v52, 1  ;;  %v1599_v39 = vadd.f32 %v1598_v38, %v1597_v15  ;;  %v1638_v21 = vrot.slane %v1628_v19, %v1637_v54 }
 0x295   : > { %v1591_v58 = vrot.slane %v1590_v4, 1  ;;  %v1582_v7 = vrot.slane %v1581_v13, 1  ;;  %v1645_v0 = vrot.slane %v1629_v11, %v1637_v54 }
 0x296   : > { %v1574_v22 = vadd.f32 %v1573_v5, %v1572_v52  ;;  %v1600_v36 = vrot.slane %v1599_v39, 1 }
 0x297   : > { %v1592_v10 = vadd.f32 %v1591_v58, %v1590_v4  ;;  %v1583_v57 = vadd.f32 %v1582_v7, %v1581_v13  ;;  %v1660_v28 = vcombine.low %v1638_v21, %v1645_v0 }
 0x298   : > { %v1601_v59 = vadd.f32 %v1600_v36, %v1599_v39  ;;  %v1616_v17 = vadd.f32 %v1611_v55, %v1574_v22 }
 0x299   : > { %v1617_v20 = vadd.f32 %v1611_v55, %v1583_v57  ;;  %v1618_v60 = vadd.f32 %v1611_v55, %v1592_v10  ;;  %v1668_v32 = vrot.slane %v1660_v28, %v1637_v54 }
 0x29a   : > { %v1619_v23 = vadd.f32 %v1611_v55, %v1601_v59 }
 0x29b   : > { %v1630_v46 = vcombine.low %v1616_v17, %v1617_v20 }
 0x29c   : > { %v1631_v41 = vcombine.low %v1618_v60, %v1619_v23 }
 0x29d   : > { %v1652_v51 = vrot.slane %v1630_v46, %v1637_v54 }
 0x29e   : > { %v1659_v14 = vrot.slane %v1631_v41, %v1637_v54 }
 0x2a0   : > { %v1661_v29 = vcombine.low %v1652_v51, %v1659_v14 }
 0x2a2   : > { %v1675_v24 = vrot.slane %v1661_v29, %v1637_v54 }
 0x2a4   : > { %v1676_v44 = vcombine.low %v1668_v32, %v1675_v24 }
 0x2a6   : > { %1678 = vst [vmem:[%s328_s26] sm:$0xff] %v1676_v44 }
 0x2a7   : > { %1858 = shalt.err (!%p1855_p3)
}
 0x2a8   : > { %s1859_s22 = scalar_lea.hbm %s1692_s30, 128  ;;  %s1863_s25 = scalar_lea.hbm %s2637_s9, 256 }
 0x2a9   : > { %p1860_p4 = scmp.ne.s32.totalorder %s1692_s30, %s1859_s22  ;;  %p1864_p9 = scmp.lt.s32.totalorder %s1692_s30, %s2637_s9 }
 0x2aa   : > { %p1865_p10 = scmp.lt.s32.totalorder %s1863_s25, %s1859_s22 }
 0x2ab   : > { %p1861_p7 = pnand %p1860_p4, %p2003_p5 }
 0x2ac   : > { %p1866_p11 = por %p1865_p10, %p1864_p9 }
 0x2ad   : > { %p1862_p8 = pneg %p1861_p7 }
 0x2af   : > { %p1867_p12 = pnand %p1866_p11, %p1862_p8 }
 0x2b1   : > { %1870 = shalt.err (!%p1867_p12)
}
 0x2b2   : > { %1786 = dma.vmem_to_hbm [thread:$0]  (%p2003_p5), %s1695_s27, 128, %s1692_s30, %s1680_s10  }
 0x2b3 PF: > { %p1792_p13 = scmp.ge.s32.totalorder %s1905_s14, 2  ;;  %s1706_s29 = sand.u32 1, %s1893_s11  }
 0x2b4   : > { %s1707_s15 = scalar_lea.sflag [#allocation4], %s1706_s29 }
 0x2b5   : > { %p1789_p0 = pnand %p1792_p13, %p2007_p6 }
 0x2b7   : > { %p1790_p1 = pneg %p1789_p0 }
 0x2b9   : > { %1888 = dma.done.wait (%p1790_p1), %s1707_s15, 128  }
 0x2ba   : > { %1890 = vsyncadd (%p1790_p1), %s1707_s15, 4294967168  ;;  %p21_p2 = scmp.ge.s32.totalorder %s1990_s16, 4   ;;  %s2689_s11 = smov %s1897_s12 }
 0x2bb   : > { %s2690_s12 = smov %s1901_s13  ;;  %s2691_s13 = smov %s2001_s19 }
 0x2bc   : > { %s2692_s14 = smov %s1990_s16  ;;  %23 = sbr.rel (!%p21_p2) target bundleno = 6 (0x6), region = 91 }
 0x2c1   :  { %1712 = vsyncpa [#allocation4], 1 }
 0x2c2   :  { %1714 = vsyncpa [#allocation4 + $0x1], 1 }

</bundles_post_ra>
